<compile_context>
chip_gen: v5e
topology: v5e:2x2
jax: 0.10.0
libtpu: 0.0.40
codegen_flags: <defaults>
</compile_context>

<pallas_src>
import jax
import jax.numpy as jnp
from jax import lax
from jax.experimental import pallas as pl
from jax.experimental.pallas import tpu as pltpu

# ----- synthetic ConfigRNN -----
VOCAB_SIZE = 32
EMBED_SIZE = 32
HIDDEN_SIZE = 32
OUTPUT_SIZE = 4
BATCH_SIZE = 2
SEQ_LEN = 8
EVAL_MODE = True  # dropout disabled (deterministic)


def rnn_kernel(tok_ref, mask_ref, eproj_ref,
               whh1_ref, wih2_ref, whh2_ref, b1_ref, b2_ref,
               fc1w_ref, fc1b_ref, fc2w_ref, fc2b_ref,
               out_ref):
    SB = tok_ref.shape[0]          # S * B (time-major flattened)
    V = eproj_ref.shape[0]
    H = whh1_ref.shape[0]
    G = whh1_ref.shape[1]          # 4H
    B = out_ref.shape[0]
    S = SB // B
    O = fc2w_ref.shape[1]

    # ---- hoisted loads / constants (loops below are fully unrolled) ----
    whh1 = whh1_ref[...]                               # (H, 4H) bf16
    wih2 = wih2_ref[...]                               # (H, 4H) bf16
    whh2 = whh2_ref[...]                               # (H, 4H) bf16
    b1 = b1_ref[...]                                   # (1, 4H) f32 (b_ih+b_hh)
    b2 = b2_ref[...]

    # validity mask, already lane-wide (S*B, H); one compare, sliced per step
    mask_wide = mask_ref[...] > 0.5                    # (S*B, H) bool

    # gate pre-scale: multiply the 'g' lane group by 2 so a SINGLE sigmoid pass
    # covers all four gates (tanh(g) = 2*sigmoid(2g) - 1).  Gate order i,f,g,o.
    lane4 = lax.broadcasted_iota(jnp.int32, (1, G), 1)
    gate_scale = jnp.where((lane4 >= 2 * H) & (lane4 < 3 * H), 2.0, 1.0)

    # ---- embedding lookup fused with layer-1 input projection ----
    # xproj1 = onehot @ (embed @ w_ih0^T) + b1, one MXU matmul on the prologue
    tok = tok_ref[...]                                  # (S*B, 1) int32
    lane = lax.broadcasted_iota(jnp.int32, (SB, V), 1)
    onehot = (lane == tok).astype(jnp.bfloat16)
    xproj1 = jnp.dot(onehot, eproj_ref[...],
                     preferred_element_type=jnp.float32) + b1   # (S*B, 4H) f32

    def lstm_step(gates, c):
        sig = jax.nn.sigmoid(gates * gate_scale)        # one full-width EUP pass
        i = sig[:, 0:H]
        f = sig[:, H:2 * H]
        g = 2.0 * sig[:, 2 * H:3 * H] - 1.0             # == tanh(raw g)
        o = sig[:, 3 * H:4 * H]
        c_new = f * c + i * g
        h_new = o * jnp.tanh(c_new)
        return h_new, c_new

    z = jnp.zeros((B, H), jnp.float32)
    h1, c1, h2, c2 = z, z, z, z

    # ---- interleaved 2-layer recurrence (fully unrolled, S=8) ----
    # layer-2 step t only depends on layer-1 step t, so layer-2[t] overlaps
    # layer-1[t+1] in the schedule; masking = pack_padded semantics.
    for t in range(S):
        m = mask_wide[t * B:(t + 1) * B]                # (B, H) bool

        g1 = xproj1[t * B:(t + 1) * B] + jnp.dot(
            h1.astype(jnp.bfloat16), whh1, preferred_element_type=jnp.float32)
        h1n, c1n = lstm_step(g1, c1)
        h1 = jnp.where(m, h1n, h1)
        c1 = jnp.where(m, c1n, c1)

        # TODO(synk): inter-layer LSTM dropout (p=0.7) skipped — eval mode.
        g2 = (jnp.dot(h1.astype(jnp.bfloat16), wih2,
                      preferred_element_type=jnp.float32)
              + jnp.dot(h2.astype(jnp.bfloat16), whh2,
                        preferred_element_type=jnp.float32) + b2)
        h2n, c2n = lstm_step(g2, c2)
        h2 = jnp.where(m, h2n, h2)
        c2 = jnp.where(m, c2n, c2)

    # ---- fc1 -> relu -> (dropout skipped, eval) -> fc2 -> log_softmax ----
    lin = jnp.dot(h2.astype(jnp.bfloat16), fc1w_ref[...],
                  preferred_element_type=jnp.float32) + fc1b_ref[...]
    lin = jnp.maximum(lin, 0.0)
    logits = jnp.dot(lin.astype(jnp.bfloat16), fc2w_ref[...],
                     preferred_element_type=jnp.float32) + fc2b_ref[...]
    mx = jnp.max(logits, axis=1, keepdims=True)
    logp = logits - (jnp.log(jnp.sum(jnp.exp(logits - mx), axis=1, keepdims=True)) + mx)

    # ---- single lane-dense output slab: [h1 | h2 | c1 | c2 | logp | pad] ----
    pad = jnp.zeros((B, 2 * G - (G + O)), jnp.float32)
    out_ref[...] = jnp.concatenate([h1, h2, c1, c2, logp, pad], axis=-1)


def init_params(key):
    ks = jax.random.split(key, 16)
    s = 0.1
    H, E, V, O = HIDDEN_SIZE, EMBED_SIZE, VOCAB_SIZE, OUTPUT_SIZE
    p = {
        "embed": jax.random.normal(ks[0], (V, E), jnp.float32) * 0.5,
        # LSTM layer 0
        "w_ih0": jax.random.normal(ks[1], (4 * H, E), jnp.float32) * s,
        "w_hh0": jax.random.normal(ks[2], (4 * H, H), jnp.float32) * s,
        "b_ih0": jax.random.normal(ks[3], (4 * H,), jnp.float32) * s,
        "b_hh0": jax.random.normal(ks[4], (4 * H,), jnp.float32) * s,
        # LSTM layer 1
        "w_ih1": jax.random.normal(ks[5], (4 * H, H), jnp.float32) * s,
        "w_hh1": jax.random.normal(ks[6], (4 * H, H), jnp.float32) * s,
        "b_ih1": jax.random.normal(ks[7], (4 * H,), jnp.float32) * s,
        "b_hh1": jax.random.normal(ks[8], (4 * H,), jnp.float32) * s,
        # fc layers
        "fc1_w": jax.random.normal(ks[9], (64, H), jnp.float32) * s,
        "fc1_b": jax.random.normal(ks[10], (64,), jnp.float32) * s,
        "fc2_w": jax.random.normal(ks[11], (O, 64), jnp.float32) * s,
        "fc2_b": jax.random.normal(ks[12], (O,), jnp.float32) * s,
    }
    return p


def prepare_params(params):
    """One-time weight prep (hoisted out of the per-forward hot path):
    transposes, bf16 casts, bias fusion, and the embedding->wih1 fold."""
    bf = jnp.bfloat16
    H, O = HIDDEN_SIZE, OUTPUT_SIZE
    wih1 = params["w_ih0"].T.astype(bf)                         # (E, 4H)
    # Fold embedding lookup into the layer-1 input projection: (V, 4H)
    eproj = jnp.dot(params["embed"].astype(bf), wih1,
                    preferred_element_type=jnp.float32).astype(bf)
    prepped = {
        "eproj": eproj,                                         # (V, 4H) bf16
        "whh1": params["w_hh0"].T.astype(bf),                   # (H, 4H) bf16
        "wih2": params["w_ih1"].T.astype(bf),                   # (H, 4H) bf16
        "whh2": params["w_hh1"].T.astype(bf),                   # (H, 4H) bf16
        "b1": (params["b_ih0"] + params["b_hh0"]).reshape(1, 4 * H),
        "b2": (params["b_ih1"] + params["b_hh1"]).reshape(1, 4 * H),
        "fc1w": params["fc1_w"].T.astype(bf),                   # (H, 64) bf16
        "fc1b": params["fc1_b"].reshape(1, 64),
        "fc2w": params["fc2_w"].T.astype(bf),                   # (64, O) bf16
        "fc2b": params["fc2_b"].reshape(1, O),
    }
    return jax.tree_util.tree_map(jnp.asarray, prepped)


@jax.jit
def rnn_forward(prepped, inputs, target):
    """inputs: (S, B, 1) int32 token ids; target: (B,) int32."""
    H, O = HIDDEN_SIZE, OUTPUT_SIZE
    tokens = jnp.transpose(inputs, (1, 0, 2))[:, :, 0]          # (B, S)
    B, S = tokens.shape

    # input_lengths = max nonzero index + 1 (assumes valid ids are in [1, VOCAB)),
    # then sort descending (pack_padded prep).  NOTE: argsort tie-breaking may
    # differ from torch.sort for equal lengths; outputs stay internally consistent.
    pos = jnp.arange(1, S + 1, dtype=jnp.int32)
    lengths = jnp.max(jnp.where(tokens != 0, pos, 0), axis=1)   # (B,)
    order = jnp.argsort(-lengths)
    tokens_s = tokens[order]
    lengths_s = lengths[order].astype(jnp.int32)
    target_s = target[order]

    # time-major flattened tokens + lane-wide validity mask for the kernel
    tok_tm = jnp.transpose(tokens_s, (1, 0)).reshape(S * B, 1).astype(jnp.int32)
    valid = jnp.arange(S, dtype=jnp.int32)[:, None] < lengths_s[None, :]  # (S, B)
    mask_wide = jnp.broadcast_to(valid.reshape(S * B, 1), (S * B, H)).astype(jnp.float32)

    vmem = pl.BlockSpec(memory_space=pltpu.MemorySpace.VMEM)
    slab = pl.pallas_call(
        rnn_kernel,
        out_shape=jax.ShapeDtypeStruct((B, 2 * 4 * H), jnp.float32),
        in_specs=[vmem] * 12,
        out_specs=vmem,
    )(tok_tm, mask_wide, prepped["eproj"],
      prepped["whh1"], prepped["wih2"], prepped["whh2"],
      prepped["b1"], prepped["b2"],
      prepped["fc1w"], prepped["fc1b"], prepped["fc2w"], prepped["fc2b"])

    h1 = slab[:, 0:H]
    h2 = slab[:, H:2 * H]
    c1 = slab[:, 2 * H:3 * H]
    c2 = slab[:, 3 * H:4 * H]
    log_probs = slab[:, 4 * H:4 * H + O]
    hidden = jnp.stack([h1, h2])
    cell = jnp.stack([c1, c2])
    return log_probs, hidden, cell, target_s


# ----- pure-JAX reference (same math, f32) for a sanity check -----
def rnn_reference(params, inputs, target):
    H, O = HIDDEN_SIZE, OUTPUT_SIZE
    tokens = jnp.transpose(inputs, (1, 0, 2))[:, :, 0]
    B, S = tokens.shape
    pos = jnp.arange(1, S + 1, dtype=jnp.int32)
    lengths = jnp.max(jnp.where(tokens != 0, pos, 0), axis=1)
    order = jnp.argsort(-lengths)
    tokens_s, lengths_s, target_s = tokens[order], lengths[order], target[order]
    emb = params["embed"][tokens_s]

    def cell_fn(x, h, c, w_ih, w_hh, b_ih, b_hh):
        g = x @ w_ih.T + h @ w_hh.T + b_ih + b_hh
        i, f, gg, o = jnp.split(g, 4, axis=-1)
        c_new = jax.nn.sigmoid(f) * c + jax.nn.sigmoid(i) * jnp.tanh(gg)
        return jax.nn.sigmoid(o) * jnp.tanh(c_new), c_new

    h1 = c1 = h2 = c2 = jnp.zeros((B, H), jnp.float32)
    for t in range(S):
        mask = (t < lengths_s)[:, None]
        h1n, c1n = cell_fn(emb[:, t], h1, c1, params["w_ih0"], params["w_hh0"],
                           params["b_ih0"], params["b_hh0"])
        h1, c1 = jnp.where(mask, h1n, h1), jnp.where(mask, c1n, c1)
        h2n, c2n = cell_fn(h1, h2, c2, params["w_ih1"], params["w_hh1"],
                           params["b_ih1"], params["b_hh1"])
        h2, c2 = jnp.where(mask, h2n, h2), jnp.where(mask, c2n, c2)
    lin = jnp.maximum(h2 @ params["fc1_w"].T + params["fc1_b"], 0.0)
    logits = lin @ params["fc2_w"].T + params["fc2_b"]
    logp = logits - jax.scipy.special.logsumexp(logits, axis=1, keepdims=True)
    hidden = jnp.stack([h1, h2]); cellst = jnp.stack([c1, c2])
    return logp, hidden, cellst, target_s


if __name__ == "__main__":
    key = jax.random.PRNGKey(0)
    pkey, ikey, tkey = jax.random.split(key, 3)
    params = init_params(pkey)
    prepped = prepare_params(params)   # one-time weight prep (not per-call)

    # tokens in [1, VOCAB), with trailing zero-padding of different lengths per batch
    tokens = jax.random.randint(ikey, (BATCH_SIZE, SEQ_LEN), 1, VOCAB_SIZE, dtype=jnp.int32)
    pad_from = jnp.array([SEQ_LEN - 2, SEQ_LEN], dtype=jnp.int32)  # batch 0 padded, batch 1 full
    mask = jnp.arange(SEQ_LEN)[None, :] < pad_from[:, None]
    tokens = jnp.where(mask, tokens, 0)
    inputs = jnp.transpose(tokens, (1, 0))[:, :, None]             # (S, B, 1)
    target = jax.random.randint(tkey, (BATCH_SIZE,), 0, OUTPUT_SIZE, dtype=jnp.int32)

    out = rnn_forward(prepped, inputs, target)
    out = jax.block_until_ready(out)
    log_probs, hidden, cell, sorted_target = out

    ref = rnn_reference(params, inputs, target)
    for a, b in zip(out[:3], ref[:3]):
        if not jnp.allclose(a, b, atol=2e-2, rtol=2e-2):
            raise AssertionError("Pallas kernel does not match JAX reference")
    if not jnp.array_equal(sorted_target, ref[3]):
        raise AssertionError("sorted target mismatch")

    print("KERNEL_OK")
</pallas_src>

<mosaic_0001>
module attributes {stable_mosaic.version = 11 : i64} {
  func.func @rnn_kernel(%arg0: memref<16x1xi32, #tpu.memory_space<vmem>>, %arg1: memref<16x32xf32, #tpu.memory_space<vmem>>, %arg2: memref<32x128xbf16, #tpu.memory_space<vmem>>, %arg3: memref<32x128xbf16, #tpu.memory_space<vmem>>, %arg4: memref<32x128xbf16, #tpu.memory_space<vmem>>, %arg5: memref<32x128xbf16, #tpu.memory_space<vmem>>, %arg6: memref<1x128xf32, #tpu.memory_space<vmem>>, %arg7: memref<1x128xf32, #tpu.memory_space<vmem>>, %arg8: memref<32x64xbf16, #tpu.memory_space<vmem>>, %arg9: memref<1x64xf32, #tpu.memory_space<vmem>>, %arg10: memref<64x4xbf16, #tpu.memory_space<vmem>>, %arg11: memref<1x4xf32, #tpu.memory_space<vmem>>, %arg12: memref<2x256xf32, #tpu.memory_space<vmem>>) attributes {dimension_semantics = [], scalar_prefetch = 0 : i64, scratch_operands = 0 : i64, tpu.core_type = #tpu.core_type<tc>} {
    %c0 = arith.constant 0 : index
    %c0_0 = arith.constant 0 : index
    %0 = vector.load %arg3[%c0, %c0_0] : memref<32x128xbf16, #tpu.memory_space<vmem>>, vector<32x128xbf16>
    %c0_1 = arith.constant 0 : index
    %c0_2 = arith.constant 0 : index
    %1 = vector.load %arg4[%c0_1, %c0_2] : memref<32x128xbf16, #tpu.memory_space<vmem>>, vector<32x128xbf16>
    %c0_3 = arith.constant 0 : index
    %c0_4 = arith.constant 0 : index
    %2 = vector.load %arg5[%c0_3, %c0_4] : memref<32x128xbf16, #tpu.memory_space<vmem>>, vector<32x128xbf16>
    %c0_5 = arith.constant 0 : index
    %c0_6 = arith.constant 0 : index
    %3 = vector.load %arg6[%c0_5, %c0_6] : memref<1x128xf32, #tpu.memory_space<vmem>>, vector<1x128xf32>
    %c0_7 = arith.constant 0 : index
    %c0_8 = arith.constant 0 : index
    %4 = vector.load %arg7[%c0_7, %c0_8] : memref<1x128xf32, #tpu.memory_space<vmem>>, vector<1x128xf32>
    %c0_9 = arith.constant 0 : index
    %c0_10 = arith.constant 0 : index
    %5 = vector.load %arg1[%c0_9, %c0_10] : memref<16x32xf32, #tpu.memory_space<vmem>>, vector<16x32xf32>
    %cst = arith.constant 5.000000e-01 : f32
    %6 = vector.broadcast %cst : f32 to vector<16x32xf32>
    %7 = arith.cmpf ogt, %5, %6 : vector<16x32xf32>
    %8 = tpu.iota {dimensions = array<i32: 1>} : vector<1x128xi32>
    %c64_i32 = arith.constant 64 : i32
    %9 = vector.broadcast %c64_i32 : i32 to vector<1x128xi32>
    %10 = arith.cmpi sge, %8, %9 : vector<1x128xi32>
    %c96_i32 = arith.constant 96 : i32
    %11 = vector.broadcast %c96_i32 : i32 to vector<1x128xi32>
    %12 = arith.cmpi slt, %8, %11 : vector<1x128xi32>
    %13 = arith.andi %10, %12 : vector<1x128xi1>
    %cst_11 = arith.constant 2.000000e+00 : f32
    %cst_12 = arith.constant 1.000000e+00 : f32
    %14 = vector.broadcast %cst_11 : f32 to vector<1x128xf32>
    %15 = vector.broadcast %cst_12 : f32 to vector<1x128xf32>
    %16 = arith.select %13, %14, %15 : vector<1x128xi1>, vector<1x128xf32>
    %c0_13 = arith.constant 0 : index
    %c0_14 = arith.constant 0 : index
    %17 = vector.load %arg0[%c0_13, %c0_14] : memref<16x1xi32, #tpu.memory_space<vmem>>, vector<16x1xi32>
    %18 = tpu.iota {dimensions = array<i32: 1>} : vector<16x32xi32>
    %19 = vector.broadcast %17 : vector<16x1xi32> to vector<16x32xi32>
    %20 = arith.cmpi eq, %18, %19 : vector<16x32xi32>
    %21 = arith.extui %20 : vector<16x32xi1> to vector<16x32xi32>
    %22 = arith.sitofp %21 : vector<16x32xi32> to vector<16x32xf32>
    %23 = arith.truncf %22 : vector<16x32xf32> to vector<16x32xbf16>
    %c0_15 = arith.constant 0 : index
    %c0_16 = arith.constant 0 : index
    %24 = vector.load %arg2[%c0_15, %c0_16] : memref<32x128xbf16, #tpu.memory_space<vmem>>, vector<32x128xbf16>
    %cst_17 = arith.constant dense<0.000000e+00> : vector<16x128xf32>
    %25 = tpu.matmul %23, %24, %cst_17 {dimension_numbers = #tpu.dot_dimension_numbers<[1], [0], [0], [1], [0, 0, 1, 1], [], []>} : vector<16x32xbf16>, vector<32x128xbf16>, vector<16x128xf32> -> vector<16x128xf32>
    %26 = vector.broadcast %3 : vector<1x128xf32> to vector<16x128xf32>
    %27 = arith.addf %25, %26 : vector<16x128xf32>
    %cst_18 = arith.constant 0.000000e+00 : f32
    %28 = vector.broadcast %cst_18 : f32 to vector<2x32xf32>
    %29 = vector.extract_strided_slice %7 {offsets = [0, 0], sizes = [2, 32], strides = [1, 1]} : vector<16x32xi1> to vector<2x32xi1>
    %30 = vector.extract_strided_slice %27 {offsets = [0, 0], sizes = [2, 128], strides = [1, 1]} : vector<16x128xf32> to vector<2x128xf32>
    %31 = arith.truncf %28 : vector<2x32xf32> to vector<2x32xbf16>
    %cst_19 = arith.constant dense<0.000000e+00> : vector<2x128xf32>
    %32 = tpu.matmul %31, %0, %cst_19 {dimension_numbers = #tpu.dot_dimension_numbers<[1], [0], [0], [1], [0, 0, 1, 1], [], []>} : vector<2x32xbf16>, vector<32x128xbf16>, vector<2x128xf32> -> vector<2x128xf32>
    %33 = arith.addf %30, %32 : vector<2x128xf32>
    %34 = vector.broadcast %16 : vector<1x128xf32> to vector<2x128xf32>
    %35 = arith.mulf %33, %34 : vector<2x128xf32>
    %36 = arith.negf %35 : vector<2x128xf32>
    %37 = math.exp %36 : vector<2x128xf32>
    %cst_20 = arith.constant 1.000000e+00 : f32
    %38 = vector.broadcast %cst_20 : f32 to vector<2x128xf32>
    %39 = arith.addf %38, %37 : vector<2x128xf32>
    %40 = arith.divf %38, %39 : vector<2x128xf32>
    %41 = vector.extract_strided_slice %40 {offsets = [0, 0], sizes = [2, 32], strides = [1, 1]} : vector<2x128xf32> to vector<2x32xf32>
    %42 = vector.extract_strided_slice %40 {offsets = [0, 32], sizes = [2, 32], strides = [1, 1]} : vector<2x128xf32> to vector<2x32xf32>
    %43 = vector.extract_strided_slice %40 {offsets = [0, 64], sizes = [2, 32], strides = [1, 1]} : vector<2x128xf32> to vector<2x32xf32>
    %cst_21 = arith.constant 2.000000e+00 : f32
    %44 = vector.broadcast %cst_21 : f32 to vector<2x32xf32>
    %45 = arith.mulf %44, %43 : vector<2x32xf32>
    %cst_22 = arith.constant 1.000000e+00 : f32
    %46 = vector.broadcast %cst_22 : f32 to vector<2x32xf32>
    %47 = arith.subf %45, %46 : vector<2x32xf32>
    %48 = vector.extract_strided_slice %40 {offsets = [0, 96], sizes = [2, 32], strides = [1, 1]} : vector<2x128xf32> to vector<2x32xf32>
    %49 = arith.mulf %42, %28 : vector<2x32xf32>
    %50 = arith.mulf %41, %47 : vector<2x32xf32>
    %51 = arith.addf %49, %50 : vector<2x32xf32>
    %52 = math.tanh %51 : vector<2x32xf32>
    %53 = arith.mulf %48, %52 : vector<2x32xf32>
    %54 = arith.select %29, %53, %28 : vector<2x32xi1>, vector<2x32xf32>
    %55 = arith.select %29, %51, %28 : vector<2x32xi1>, vector<2x32xf32>
    %56 = arith.truncf %54 : vector<2x32xf32> to vector<2x32xbf16>
    %cst_23 = arith.constant dense<0.000000e+00> : vector<2x128xf32>
    %57 = tpu.matmul %56, %1, %cst_23 {dimension_numbers = #tpu.dot_dimension_numbers<[1], [0], [0], [1], [0, 0, 1, 1], [], []>} : vector<2x32xbf16>, vector<32x128xbf16>, vector<2x128xf32> -> vector<2x128xf32>
    %58 = arith.truncf %28 : vector<2x32xf32> to vector<2x32xbf16>
    %cst_24 = arith.constant dense<0.000000e+00> : vector<2x128xf32>
    %59 = tpu.matmul %58, %2, %cst_24 {dimension_numbers = #tpu.dot_dimension_numbers<[1], [0], [0], [1], [0, 0, 1, 1], [], []>} : vector<2x32xbf16>, vector<32x128xbf16>, vector<2x128xf32> -> vector<2x128xf32>
    %60 = arith.addf %57, %59 : vector<2x128xf32>
    %61 = vector.broadcast %4 : vector<1x128xf32> to vector<2x128xf32>
    %62 = arith.addf %60, %61 : vector<2x128xf32>
    %63 = vector.broadcast %16 : vector<1x128xf32> to vector<2x128xf32>
    %64 = arith.mulf %62, %63 : vector<2x128xf32>
    %65 = arith.negf %64 : vector<2x128xf32>
    %66 = math.exp %65 : vector<2x128xf32>
    %cst_25 = arith.constant 1.000000e+00 : f32
    %67 = vector.broadcast %cst_25 : f32 to vector<2x128xf32>
    %68 = arith.addf %67, %66 : vector<2x128xf32>
    %69 = arith.divf %67, %68 : vector<2x128xf32>
    %70 = vector.extract_strided_slice %69 {offsets = [0, 0], sizes = [2, 32], strides = [1, 1]} : vector<2x128xf32> to vector<2x32xf32>
    %71 = vector.extract_strided_slice %69 {offsets = [0, 32], sizes = [2, 32], strides = [1, 1]} : vector<2x128xf32> to vector<2x32xf32>
    %72 = vector.extract_strided_slice %69 {offsets = [0, 64], sizes = [2, 32], strides = [1, 1]} : vector<2x128xf32> to vector<2x32xf32>
    %cst_26 = arith.constant 2.000000e+00 : f32
    %73 = vector.broadcast %cst_26 : f32 to vector<2x32xf32>
    %74 = arith.mulf %73, %72 : vector<2x32xf32>
    %cst_27 = arith.constant 1.000000e+00 : f32
    %75 = vector.broadcast %cst_27 : f32 to vector<2x32xf32>
    %76 = arith.subf %74, %75 : vector<2x32xf32>
    %77 = vector.extract_strided_slice %69 {offsets = [0, 96], sizes = [2, 32], strides = [1, 1]} : vector<2x128xf32> to vector<2x32xf32>
    %78 = arith.mulf %71, %28 : vector<2x32xf32>
    %79 = arith.mulf %70, %76 : vector<2x32xf32>
    %80 = arith.addf %78, %79 : vector<2x32xf32>
    %81 = math.tanh %80 : vector<2x32xf32>
    %82 = arith.mulf %77, %81 : vector<2x32xf32>
    %83 = arith.select %29, %82, %28 : vector<2x32xi1>, vector<2x32xf32>
    %84 = arith.select %29, %80, %28 : vector<2x32xi1>, vector<2x32xf32>
    %85 = vector.extract_strided_slice %7 {offsets = [2, 0], sizes = [2, 32], strides = [1, 1]} : vector<16x32xi1> to vector<2x32xi1>
    %86 = vector.extract_strided_slice %27 {offsets = [2, 0], sizes = [2, 128], strides = [1, 1]} : vector<16x128xf32> to vector<2x128xf32>
    %87 = arith.truncf %54 : vector<2x32xf32> to vector<2x32xbf16>
    %cst_28 = arith.constant dense<0.000000e+00> : vector<2x128xf32>
    %88 = tpu.matmul %87, %0, %cst_28 {dimension_numbers = #tpu.dot_dimension_numbers<[1], [0], [0], [1], [0, 0, 1, 1], [], []>} : vector<2x32xbf16>, vector<32x128xbf16>, vector<2x128xf32> -> vector<2x128xf32>
    %89 = arith.addf %86, %88 : vector<2x128xf32>
    %90 = vector.broadcast %16 : vector<1x128xf32> to vector<2x128xf32>
    %91 = arith.mulf %89, %90 : vector<2x128xf32>
    %92 = arith.negf %91 : vector<2x128xf32>
    %93 = math.exp %92 : vector<2x128xf32>
    %cst_29 = arith.constant 1.000000e+00 : f32
    %94 = vector.broadcast %cst_29 : f32 to vector<2x128xf32>
    %95 = arith.addf %94, %93 : vector<2x128xf32>
    %96 = arith.divf %94, %95 : vector<2x128xf32>
    %97 = vector.extract_strided_slice %96 {offsets = [0, 0], sizes = [2, 32], strides = [1, 1]} : vector<2x128xf32> to vector<2x32xf32>
    %98 = vector.extract_strided_slice %96 {offsets = [0, 32], sizes = [2, 32], strides = [1, 1]} : vector<2x128xf32> to vector<2x32xf32>
    %99 = vector.extract_strided_slice %96 {offsets = [0, 64], sizes = [2, 32], strides = [1, 1]} : vector<2x128xf32> to vector<2x32xf32>
    %cst_30 = arith.constant 2.000000e+00 : f32
    %100 = vector.broadcast %cst_30 : f32 to vector<2x32xf32>
    %101 = arith.mulf %100, %99 : vector<2x32xf32>
    %cst_31 = arith.constant 1.000000e+00 : f32
    %102 = vector.broadcast %cst_31 : f32 to vector<2x32xf32>
    %103 = arith.subf %101, %102 : vector<2x32xf32>
    %104 = vector.extract_strided_slice %96 {offsets = [0, 96], sizes = [2, 32], strides = [1, 1]} : vector<2x128xf32> to vector<2x32xf32>
    %105 = arith.mulf %98, %55 : vector<2x32xf32>
    %106 = arith.mulf %97, %103 : vector<2x32xf32>
    %107 = arith.addf %105, %106 : vector<2x32xf32>
    %108 = math.tanh %107 : vector<2x32xf32>
    %109 = arith.mulf %104, %108 : vector<2x32xf32>
    %110 = arith.select %85, %109, %54 : vector<2x32xi1>, vector<2x32xf32>
    %111 = arith.select %85, %107, %55 : vector<2x32xi1>, vector<2x32xf32>
    %112 = arith.truncf %110 : vector<2x32xf32> to vector<2x32xbf16>
    %cst_32 = arith.constant dense<0.000000e+00> : vector<2x128xf32>
    %113 = tpu.matmul %112, %1, %cst_32 {dimension_numbers = #tpu.dot_dimension_numbers<[1], [0], [0], [1], [0, 0, 1, 1], [], []>} : vector<2x32xbf16>, vector<32x128xbf16>, vector<2x128xf32> -> vector<2x128xf32>
    %114 = arith.truncf %83 : vector<2x32xf32> to vector<2x32xbf16>
    %cst_33 = arith.constant dense<0.000000e+00> : vector<2x128xf32>
    %115 = tpu.matmul %114, %2, %cst_33 {dimension_numbers = #tpu.dot_dimension_numbers<[1], [0], [0], [1], [0, 0, 1, 1], [], []>} : vector<2x32xbf16>, vector<32x128xbf16>, vector<2x128xf32> -> vector<2x128xf32>
    %116 = arith.addf %113, %115 : vector<2x128xf32>
    %117 = vector.broadcast %4 : vector<1x128xf32> to vector<2x128xf32>
    %118 = arith.addf %116, %117 : vector<2x128xf32>
    %119 = vector.broadcast %16 : vector<1x128xf32> to vector<2x128xf32>
    %120 = arith.mulf %118, %119 : vector<2x128xf32>
    %121 = arith.negf %120 : vector<2x128xf32>
    %122 = math.exp %121 : vector<2x128xf32>
    %cst_34 = arith.constant 1.000000e+00 : f32
    %123 = vector.broadcast %cst_34 : f32 to vector<2x128xf32>
    %124 = arith.addf %123, %122 : vector<2x128xf32>
    %125 = arith.divf %123, %124 : vector<2x128xf32>
    %126 = vector.extract_strided_slice %125 {offsets = [0, 0], sizes = [2, 32], strides = [1, 1]} : vector<2x128xf32> to vector<2x32xf32>
    %127 = vector.extract_strided_slice %125 {offsets = [0, 32], sizes = [2, 32], strides = [1, 1]} : vector<2x128xf32> to vector<2x32xf32>
    %128 = vector.extract_strided_slice %125 {offsets = [0, 64], sizes = [2, 32], strides = [1, 1]} : vector<2x128xf32> to vector<2x32xf32>
    %cst_35 = arith.constant 2.000000e+00 : f32
    %129 = vector.broadcast %cst_35 : f32 to vector<2x32xf32>
    %130 = arith.mulf %129, %128 : vector<2x32xf32>
    %cst_36 = arith.constant 1.000000e+00 : f32
    %131 = vector.broadcast %cst_36 : f32 to vector<2x32xf32>
    %132 = arith.subf %130, %131 : vector<2x32xf32>
    %133 = vector.extract_strided_slice %125 {offsets = [0, 96], sizes = [2, 32], strides = [1, 1]} : vector<2x128xf32> to vector<2x32xf32>
    %134 = arith.mulf %127, %84 : vector<2x32xf32>
    %135 = arith.mulf %126, %132 : vector<2x32xf32>
    %136 = arith.addf %134, %135 : vector<2x32xf32>
    %137 = math.tanh %136 : vector<2x32xf32>
    %138 = arith.mulf %133, %137 : vector<2x32xf32>
    %139 = arith.select %85, %138, %83 : vector<2x32xi1>, vector<2x32xf32>
    %140 = arith.select %85, %136, %84 : vector<2x32xi1>, vector<2x32xf32>
    %141 = vector.extract_strided_slice %7 {offsets = [4, 0], sizes = [2, 32], strides = [1, 1]} : vector<16x32xi1> to vector<2x32xi1>
    %142 = vector.extract_strided_slice %27 {offsets = [4, 0], sizes = [2, 128], strides = [1, 1]} : vector<16x128xf32> to vector<2x128xf32>
    %143 = arith.truncf %110 : vector<2x32xf32> to vector<2x32xbf16>
    %cst_37 = arith.constant dense<0.000000e+00> : vector<2x128xf32>
    %144 = tpu.matmul %143, %0, %cst_37 {dimension_numbers = #tpu.dot_dimension_numbers<[1], [0], [0], [1], [0, 0, 1, 1], [], []>} : vector<2x32xbf16>, vector<32x128xbf16>, vector<2x128xf32> -> vector<2x128xf32>
    %145 = arith.addf %142, %144 : vector<2x128xf32>
    %146 = vector.broadcast %16 : vector<1x128xf32> to vector<2x128xf32>
    %147 = arith.mulf %145, %146 : vector<2x128xf32>
    %148 = arith.negf %147 : vector<2x128xf32>
    %149 = math.exp %148 : vector<2x128xf32>
    %cst_38 = arith.constant 1.000000e+00 : f32
    %150 = vector.broadcast %cst_38 : f32 to vector<2x128xf32>
    %151 = arith.addf %150, %149 : vector<2x128xf32>
    %152 = arith.divf %150, %151 : vector<2x128xf32>
    %153 = vector.extract_strided_slice %152 {offsets = [0, 0], sizes = [2, 32], strides = [1, 1]} : vector<2x128xf32> to vector<2x32xf32>
    %154 = vector.extract_strided_slice %152 {offsets = [0, 32], sizes = [2, 32], strides = [1, 1]} : vector<2x128xf32> to vector<2x32xf32>
    %155 = vector.extract_strided_slice %152 {offsets = [0, 64], sizes = [2, 32], strides = [1, 1]} : vector<2x128xf32> to vector<2x32xf32>
    %cst_39 = arith.constant 2.000000e+00 : f32
    %156 = vector.broadcast %cst_39 : f32 to vector<2x32xf32>
    %157 = arith.mulf %156, %155 : vector<2x32xf32>
    %cst_40 = arith.constant 1.000000e+00 : f32
    %158 = vector.broadcast %cst_40 : f32 to vector<2x32xf32>
    %159 = arith.subf %157, %158 : vector<2x32xf32>
    %160 = vector.extract_strided_slice %152 {offsets = [0, 96], sizes = [2, 32], strides = [1, 1]} : vector<2x128xf32> to vector<2x32xf32>
    %161 = arith.mulf %154, %111 : vector<2x32xf32>
    %162 = arith.mulf %153, %159 : vector<2x32xf32>
    %163 = arith.addf %161, %162 : vector<2x32xf32>
    %164 = math.tanh %163 : vector<2x32xf32>
    %165 = arith.mulf %160, %164 : vector<2x32xf32>
    %166 = arith.select %141, %165, %110 : vector<2x32xi1>, vector<2x32xf32>
    %167 = arith.select %141, %163, %111 : vector<2x32xi1>, vector<2x32xf32>
    %168 = arith.truncf %166 : vector<2x32xf32> to vector<2x32xbf16>
    %cst_41 = arith.constant dense<0.000000e+00> : vector<2x128xf32>
    %169 = tpu.matmul %168, %1, %cst_41 {dimension_numbers = #tpu.dot_dimension_numbers<[1], [0], [0], [1], [0, 0, 1, 1], [], []>} : vector<2x32xbf16>, vector<32x128xbf16>, vector<2x128xf32> -> vector<2x128xf32>
    %170 = arith.truncf %139 : vector<2x32xf32> to vector<2x32xbf16>
    %cst_42 = arith.constant dense<0.000000e+00> : vector<2x128xf32>
    %171 = tpu.matmul %170, %2, %cst_42 {dimension_numbers = #tpu.dot_dimension_numbers<[1], [0], [0], [1], [0, 0, 1, 1], [], []>} : vector<2x32xbf16>, vector<32x128xbf16>, vector<2x128xf32> -> vector<2x128xf32>
    %172 = arith.addf %169, %171 : vector<2x128xf32>
    %173 = vector.broadcast %4 : vector<1x128xf32> to vector<2x128xf32>
    %174 = arith.addf %172, %173 : vector<2x128xf32>
    %175 = vector.broadcast %16 : vector<1x128xf32> to vector<2x128xf32>
    %176 = arith.mulf %174, %175 : vector<2x128xf32>
    %177 = arith.negf %176 : vector<2x128xf32>
    %178 = math.exp %177 : vector<2x128xf32>
    %cst_43 = arith.constant 1.000000e+00 : f32
    %179 = vector.broadcast %cst_43 : f32 to vector<2x128xf32>
    %180 = arith.addf %179, %178 : vector<2x128xf32>
    %181 = arith.divf %179, %180 : vector<2x128xf32>
    %182 = vector.extract_strided_slice %181 {offsets = [0, 0], sizes = [2, 32], strides = [1, 1]} : vector<2x128xf32> to vector<2x32xf32>
    %183 = vector.extract_strided_slice %181 {offsets = [0, 32], sizes = [2, 32], strides = [1, 1]} : vector<2x128xf32> to vector<2x32xf32>
    %184 = vector.extract_strided_slice %181 {offsets = [0, 64], sizes = [2, 32], strides = [1, 1]} : vector<2x128xf32> to vector<2x32xf32>
    %cst_44 = arith.constant 2.000000e+00 : f32
    %185 = vector.broadcast %cst_44 : f32 to vector<2x32xf32>
    %186 = arith.mulf %185, %184 : vector<2x32xf32>
    %cst_45 = arith.constant 1.000000e+00 : f32
    %187 = vector.broadcast %cst_45 : f32 to vector<2x32xf32>
    %188 = arith.subf %186, %187 : vector<2x32xf32>
    %189 = vector.extract_strided_slice %181 {offsets = [0, 96], sizes = [2, 32], strides = [1, 1]} : vector<2x128xf32> to vector<2x32xf32>
    %190 = arith.mulf %183, %140 : vector<2x32xf32>
    %191 = arith.mulf %182, %188 : vector<2x32xf32>
    %192 = arith.addf %190, %191 : vector<2x32xf32>
    %193 = math.tanh %192 : vector<2x32xf32>
    %194 = arith.mulf %189, %193 : vector<2x32xf32>
    %195 = arith.select %141, %194, %139 : vector<2x32xi1>, vector<2x32xf32>
    %196 = arith.select %141, %192, %140 : vector<2x32xi1>, vector<2x32xf32>
    %197 = vector.extract_strided_slice %7 {offsets = [6, 0], sizes = [2, 32], strides = [1, 1]} : vector<16x32xi1> to vector<2x32xi1>
    %198 = vector.extract_strided_slice %27 {offsets = [6, 0], sizes = [2, 128], strides = [1, 1]} : vector<16x128xf32> to vector<2x128xf32>
    %199 = arith.truncf %166 : vector<2x32xf32> to vector<2x32xbf16>
    %cst_46 = arith.constant dense<0.000000e+00> : vector<2x128xf32>
    %200 = tpu.matmul %199, %0, %cst_46 {dimension_numbers = #tpu.dot_dimension_numbers<[1], [0], [0], [1], [0, 0, 1, 1], [], []>} : vector<2x32xbf16>, vector<32x128xbf16>, vector<2x128xf32> -> vector<2x128xf32>
    %201 = arith.addf %198, %200 : vector<2x128xf32>
    %202 = vector.broadcast %16 : vector<1x128xf32> to vector<2x128xf32>
    %203 = arith.mulf %201, %202 : vector<2x128xf32>
    %204 = arith.negf %203 : vector<2x128xf32>
    %205 = math.exp %204 : vector<2x128xf32>
    %cst_47 = arith.constant 1.000000e+00 : f32
    %206 = vector.broadcast %cst_47 : f32 to vector<2x128xf32>
    %207 = arith.addf %206, %205 : vector<2x128xf32>
    %208 = arith.divf %206, %207 : vector<2x128xf32>
    %209 = vector.extract_strided_slice %208 {offsets = [0, 0], sizes = [2, 32], strides = [1, 1]} : vector<2x128xf32> to vector<2x32xf32>
    %210 = vector.extract_strided_slice %208 {offsets = [0, 32], sizes = [2, 32], strides = [1, 1]} : vector<2x128xf32> to vector<2x32xf32>
    %211 = vector.extract_strided_slice %208 {offsets = [0, 64], sizes = [2, 32], strides = [1, 1]} : vector<2x128xf32> to vector<2x32xf32>
    %cst_48 = arith.constant 2.000000e+00 : f32
    %212 = vector.broadcast %cst_48 : f32 to vector<2x32xf32>
    %213 = arith.mulf %212, %211 : vector<2x32xf32>
    %cst_49 = arith.constant 1.000000e+00 : f32
    %214 = vector.broadcast %cst_49 : f32 to vector<2x32xf32>
    %215 = arith.subf %213, %214 : vector<2x32xf32>
    %216 = vector.extract_strided_slice %208 {offsets = [0, 96], sizes = [2, 32], strides = [1, 1]} : vector<2x128xf32> to vector<2x32xf32>
    %217 = arith.mulf %210, %167 : vector<2x32xf32>
    %218 = arith.mulf %209, %215 : vector<2x32xf32>
    %219 = arith.addf %217, %218 : vector<2x32xf32>
    %220 = math.tanh %219 : vector<2x32xf32>
    %221 = arith.mulf %216, %220 : vector<2x32xf32>
    %222 = arith.select %197, %221, %166 : vector<2x32xi1>, vector<2x32xf32>
    %223 = arith.select %197, %219, %167 : vector<2x32xi1>, vector<2x32xf32>
    %224 = arith.truncf %222 : vector<2x32xf32> to vector<2x32xbf16>
    %cst_50 = arith.constant dense<0.000000e+00> : vector<2x128xf32>
    %225 = tpu.matmul %224, %1, %cst_50 {dimension_numbers = #tpu.dot_dimension_numbers<[1], [0], [0], [1], [0, 0, 1, 1], [], []>} : vector<2x32xbf16>, vector<32x128xbf16>, vector<2x128xf32> -> vector<2x128xf32>
    %226 = arith.truncf %195 : vector<2x32xf32> to vector<2x32xbf16>
    %cst_51 = arith.constant dense<0.000000e+00> : vector<2x128xf32>
    %227 = tpu.matmul %226, %2, %cst_51 {dimension_numbers = #tpu.dot_dimension_numbers<[1], [0], [0], [1], [0, 0, 1, 1], [], []>} : vector<2x32xbf16>, vector<32x128xbf16>, vector<2x128xf32> -> vector<2x128xf32>
    %228 = arith.addf %225, %227 : vector<2x128xf32>
    %229 = vector.broadcast %4 : vector<1x128xf32> to vector<2x128xf32>
    %230 = arith.addf %228, %229 : vector<2x128xf32>
    %231 = vector.broadcast %16 : vector<1x128xf32> to vector<2x128xf32>
    %232 = arith.mulf %230, %231 : vector<2x128xf32>
    %233 = arith.negf %232 : vector<2x128xf32>
    %234 = math.exp %233 : vector<2x128xf32>
    %cst_52 = arith.constant 1.000000e+00 : f32
    %235 = vector.broadcast %cst_52 : f32 to vector<2x128xf32>
    %236 = arith.addf %235, %234 : vector<2x128xf32>
    %237 = arith.divf %235, %236 : vector<2x128xf32>
    %238 = vector.extract_strided_slice %237 {offsets = [0, 0], sizes = [2, 32], strides = [1, 1]} : vector<2x128xf32> to vector<2x32xf32>
    %239 = vector.extract_strided_slice %237 {offsets = [0, 32], sizes = [2, 32], strides = [1, 1]} : vector<2x128xf32> to vector<2x32xf32>
    %240 = vector.extract_strided_slice %237 {offsets = [0, 64], sizes = [2, 32], strides = [1, 1]} : vector<2x128xf32> to vector<2x32xf32>
    %cst_53 = arith.constant 2.000000e+00 : f32
    %241 = vector.broadcast %cst_53 : f32 to vector<2x32xf32>
    %242 = arith.mulf %241, %240 : vector<2x32xf32>
    %cst_54 = arith.constant 1.000000e+00 : f32
    %243 = vector.broadcast %cst_54 : f32 to vector<2x32xf32>
    %244 = arith.subf %242, %243 : vector<2x32xf32>
    %245 = vector.extract_strided_slice %237 {offsets = [0, 96], sizes = [2, 32], strides = [1, 1]} : vector<2x128xf32> to vector<2x32xf32>
    %246 = arith.mulf %239, %196 : vector<2x32xf32>
    %247 = arith.mulf %238, %244 : vector<2x32xf32>
    %248 = arith.addf %246, %247 : vector<2x32xf32>
    %249 = math.tanh %248 : vector<2x32xf32>
    %250 = arith.mulf %245, %249 : vector<2x32xf32>
    %251 = arith.select %197, %250, %195 : vector<2x32xi1>, vector<2x32xf32>
    %252 = arith.select %197, %248, %196 : vector<2x32xi1>, vector<2x32xf32>
    %253 = vector.extract_strided_slice %7 {offsets = [8, 0], sizes = [2, 32], strides = [1, 1]} : vector<16x32xi1> to vector<2x32xi1>
    %254 = vector.extract_strided_slice %27 {offsets = [8, 0], sizes = [2, 128], strides = [1, 1]} : vector<16x128xf32> to vector<2x128xf32>
    %255 = arith.truncf %222 : vector<2x32xf32> to vector<2x32xbf16>
    %cst_55 = arith.constant dense<0.000000e+00> : vector<2x128xf32>
    %256 = tpu.matmul %255, %0, %cst_55 {dimension_numbers = #tpu.dot_dimension_numbers<[1], [0], [0], [1], [0, 0, 1, 1], [], []>} : vector<2x32xbf16>, vector<32x128xbf16>, vector<2x128xf32> -> vector<2x128xf32>
    %257 = arith.addf %254, %256 : vector<2x128xf32>
    %258 = vector.broadcast %16 : vector<1x128xf32> to vector<2x128xf32>
    %259 = arith.mulf %257, %258 : vector<2x128xf32>
    %260 = arith.negf %259 : vector<2x128xf32>
    %261 = math.exp %260 : vector<2x128xf32>
    %cst_56 = arith.constant 1.000000e+00 : f32
    %262 = vector.broadcast %cst_56 : f32 to vector<2x128xf32>
    %263 = arith.addf %262, %261 : vector<2x128xf32>
    %264 = arith.divf %262, %263 : vector<2x128xf32>
    %265 = vector.extract_strided_slice %264 {offsets = [0, 0], sizes = [2, 32], strides = [1, 1]} : vector<2x128xf32> to vector<2x32xf32>
    %266 = vector.extract_strided_slice %264 {offsets = [0, 32], sizes = [2, 32], strides = [1, 1]} : vector<2x128xf32> to vector<2x32xf32>
    %267 = vector.extract_strided_slice %264 {offsets = [0, 64], sizes = [2, 32], strides = [1, 1]} : vector<2x128xf32> to vector<2x32xf32>
    %cst_57 = arith.constant 2.000000e+00 : f32
    %268 = vector.broadcast %cst_57 : f32 to vector<2x32xf32>
    %269 = arith.mulf %268, %267 : vector<2x32xf32>
    %cst_58 = arith.constant 1.000000e+00 : f32
    %270 = vector.broadcast %cst_58 : f32 to vector<2x32xf32>
    %271 = arith.subf %269, %270 : vector<2x32xf32>
    %272 = vector.extract_strided_slice %264 {offsets = [0, 96], sizes = [2, 32], strides = [1, 1]} : vector<2x128xf32> to vector<2x32xf32>
    %273 = arith.mulf %266, %223 : vector<2x32xf32>
    %274 = arith.mulf %265, %271 : vector<2x32xf32>
    %275 = arith.addf %273, %274 : vector<2x32xf32>
    %276 = math.tanh %275 : vector<2x32xf32>
    %277 = arith.mulf %272, %276 : vector<2x32xf32>
    %278 = arith.select %253, %277, %222 : vector<2x32xi1>, vector<2x32xf32>
    %279 = arith.select %253, %275, %223 : vector<2x32xi1>, vector<2x32xf32>
    %280 = arith.truncf %278 : vector<2x32xf32> to vector<2x32xbf16>
    %cst_59 = arith.constant dense<0.000000e+00> : vector<2x128xf32>
    %281 = tpu.matmul %280, %1, %cst_59 {dimension_numbers = #tpu.dot_dimension_numbers<[1], [0], [0], [1], [0, 0, 1, 1], [], []>} : vector<2x32xbf16>, vector<32x128xbf16>, vector<2x128xf32> -> vector<2x128xf32>
    %282 = arith.truncf %251 : vector<2x32xf32> to vector<2x32xbf16>
    %cst_60 = arith.constant dense<0.000000e+00> : vector<2x128xf32>
    %283 = tpu.matmul %282, %2, %cst_60 {dimension_numbers = #tpu.dot_dimension_numbers<[1], [0], [0], [1], [0, 0, 1, 1], [], []>} : vector<2x32xbf16>, vector<32x128xbf16>, vector<2x128xf32> -> vector<2x128xf32>
    %284 = arith.addf %281, %283 : vector<2x128xf32>
    %285 = vector.broadcast %4 : vector<1x128xf32> to vector<2x128xf32>
    %286 = arith.addf %284, %285 : vector<2x128xf32>
    %287 = vector.broadcast %16 : vector<1x128xf32> to vector<2x128xf32>
    %288 = arith.mulf %286, %287 : vector<2x128xf32>
    %289 = arith.negf %288 : vector<2x128xf32>
    %290 = math.exp %289 : vector<2x128xf32>
    %cst_61 = arith.constant 1.000000e+00 : f32
    %291 = vector.broadcast %cst_61 : f32 to vector<2x128xf32>
    %292 = arith.addf %291, %290 : vector<2x128xf32>
    %293 = arith.divf %291, %292 : vector<2x128xf32>
    %294 = vector.extract_strided_slice %293 {offsets = [0, 0], sizes = [2, 32], strides = [1, 1]} : vector<2x128xf32> to vector<2x32xf32>
    %295 = vector.extract_strided_slice %293 {offsets = [0, 32], sizes = [2, 32], strides = [1, 1]} : vector<2x128xf32> to vector<2x32xf32>
    %296 = vector.extract_strided_slice %293 {offsets = [0, 64], sizes = [2, 32], strides = [1, 1]} : vector<2x128xf32> to vector<2x32xf32>
    %cst_62 = arith.constant 2.000000e+00 : f32
    %297 = vector.broadcast %cst_62 : f32 to vector<2x32xf32>
    %298 = arith.mulf %297, %296 : vector<2x32xf32>
    %cst_63 = arith.constant 1.000000e+00 : f32
    %299 = vector.broadcast %cst_63 : f32 to vector<2x32xf32>
    %300 = arith.subf %298, %299 : vector<2x32xf32>
    %301 = vector.extract_strided_slice %293 {offsets = [0, 96], sizes = [2, 32], strides = [1, 1]} : vector<2x128xf32> to vector<2x32xf32>
    %302 = arith.mulf %295, %252 : vector<2x32xf32>
    %303 = arith.mulf %294, %300 : vector<2x32xf32>
    %304 = arith.addf %302, %303 : vector<2x32xf32>
    %305 = math.tanh %304 : vector<2x32xf32>
    %306 = arith.mulf %301, %305 : vector<2x32xf32>
    %307 = arith.select %253, %306, %251 : vector<2x32xi1>, vector<2x32xf32>
    %308 = arith.select %253, %304, %252 : vector<2x32xi1>, vector<2x32xf32>
    %309 = vector.extract_strided_slice %7 {offsets = [10, 0], sizes = [2, 32], strides = [1, 1]} : vector<16x32xi1> to vector<2x32xi1>
    %310 = vector.extract_strided_slice %27 {offsets = [10, 0], sizes = [2, 128], strides = [1, 1]} : vector<16x128xf32> to vector<2x128xf32>
    %311 = arith.truncf %278 : vector<2x32xf32> to vector<2x32xbf16>
    %cst_64 = arith.constant dense<0.000000e+00> : vector<2x128xf32>
    %312 = tpu.matmul %311, %0, %cst_64 {dimension_numbers = #tpu.dot_dimension_numbers<[1], [0], [0], [1], [0, 0, 1, 1], [], []>} : vector<2x32xbf16>, vector<32x128xbf16>, vector<2x128xf32> -> vector<2x128xf32>
    %313 = arith.addf %310, %312 : vector<2x128xf32>
    %314 = vector.broadcast %16 : vector<1x128xf32> to vector<2x128xf32>
    %315 = arith.mulf %313, %314 : vector<2x128xf32>
    %316 = arith.negf %315 : vector<2x128xf32>
    %317 = math.exp %316 : vector<2x128xf32>
    %cst_65 = arith.constant 1.000000e+00 : f32
    %318 = vector.broadcast %cst_65 : f32 to vector<2x128xf32>
    %319 = arith.addf %318, %317 : vector<2x128xf32>
    %320 = arith.divf %318, %319 : vector<2x128xf32>
    %321 = vector.extract_strided_slice %320 {offsets = [0, 0], sizes = [2, 32], strides = [1, 1]} : vector<2x128xf32> to vector<2x32xf32>
    %322 = vector.extract_strided_slice %320 {offsets = [0, 32], sizes = [2, 32], strides = [1, 1]} : vector<2x128xf32> to vector<2x32xf32>
    %323 = vector.extract_strided_slice %320 {offsets = [0, 64], sizes = [2, 32], strides = [1, 1]} : vector<2x128xf32> to vector<2x32xf32>
    %cst_66 = arith.constant 2.000000e+00 : f32
    %324 = vector.broadcast %cst_66 : f32 to vector<2x32xf32>
    %325 = arith.mulf %324, %323 : vector<2x32xf32>
    %cst_67 = arith.constant 1.000000e+00 : f32
    %326 = vector.broadcast %cst_67 : f32 to vector<2x32xf32>
    %327 = arith.subf %325, %326 : vector<2x32xf32>
    %328 = vector.extract_strided_slice %320 {offsets = [0, 96], sizes = [2, 32], strides = [1, 1]} : vector<2x128xf32> to vector<2x32xf32>
    %329 = arith.mulf %322, %279 : vector<2x32xf32>
    %330 = arith.mulf %321, %327 : vector<2x32xf32>
    %331 = arith.addf %329, %330 : vector<2x32xf32>
    %332 = math.tanh %331 : vector<2x32xf32>
    %333 = arith.mulf %328, %332 : vector<2x32xf32>
    %334 = arith.select %309, %333, %278 : vector<2x32xi1>, vector<2x32xf32>
    %335 = arith.select %309, %331, %279 : vector<2x32xi1>, vector<2x32xf32>
    %336 = arith.truncf %334 : vector<2x32xf32> to vector<2x32xbf16>
    %cst_68 = arith.constant dense<0.000000e+00> : vector<2x128xf32>
    %337 = tpu.matmul %336, %1, %cst_68 {dimension_numbers = #tpu.dot_dimension_numbers<[1], [0], [0], [1], [0, 0, 1, 1], [], []>} : vector<2x32xbf16>, vector<32x128xbf16>, vector<2x128xf32> -> vector<2x128xf32>
    %338 = arith.truncf %307 : vector<2x32xf32> to vector<2x32xbf16>
    %cst_69 = arith.constant dense<0.000000e+00> : vector<2x128xf32>
    %339 = tpu.matmul %338, %2, %cst_69 {dimension_numbers = #tpu.dot_dimension_numbers<[1], [0], [0], [1], [0, 0, 1, 1], [], []>} : vector<2x32xbf16>, vector<32x128xbf16>, vector<2x128xf32> -> vector<2x128xf32>
    %340 = arith.addf %337, %339 : vector<2x128xf32>
    %341 = vector.broadcast %4 : vector<1x128xf32> to vector<2x128xf32>
    %342 = arith.addf %340, %341 : vector<2x128xf32>
    %343 = vector.broadcast %16 : vector<1x128xf32> to vector<2x128xf32>
    %344 = arith.mulf %342, %343 : vector<2x128xf32>
    %345 = arith.negf %344 : vector<2x128xf32>
    %346 = math.exp %345 : vector<2x128xf32>
    %cst_70 = arith.constant 1.000000e+00 : f32
    %347 = vector.broadcast %cst_70 : f32 to vector<2x128xf32>
    %348 = arith.addf %347, %346 : vector<2x128xf32>
    %349 = arith.divf %347, %348 : vector<2x128xf32>
    %350 = vector.extract_strided_slice %349 {offsets = [0, 0], sizes = [2, 32], strides = [1, 1]} : vector<2x128xf32> to vector<2x32xf32>
    %351 = vector.extract_strided_slice %349 {offsets = [0, 32], sizes = [2, 32], strides = [1, 1]} : vector<2x128xf32> to vector<2x32xf32>
    %352 = vector.extract_strided_slice %349 {offsets = [0, 64], sizes = [2, 32], strides = [1, 1]} : vector<2x128xf32> to vector<2x32xf32>
    %cst_71 = arith.constant 2.000000e+00 : f32
    %353 = vector.broadcast %cst_71 : f32 to vector<2x32xf32>
    %354 = arith.mulf %353, %352 : vector<2x32xf32>
    %cst_72 = arith.constant 1.000000e+00 : f32
    %355 = vector.broadcast %cst_72 : f32 to vector<2x32xf32>
    %356 = arith.subf %354, %355 : vector<2x32xf32>
    %357 = vector.extract_strided_slice %349 {offsets = [0, 96], sizes = [2, 32], strides = [1, 1]} : vector<2x128xf32> to vector<2x32xf32>
    %358 = arith.mulf %351, %308 : vector<2x32xf32>
    %359 = arith.mulf %350, %356 : vector<2x32xf32>
    %360 = arith.addf %358, %359 : vector<2x32xf32>
    %361 = math.tanh %360 : vector<2x32xf32>
    %362 = arith.mulf %357, %361 : vector<2x32xf32>
    %363 = arith.select %309, %362, %307 : vector<2x32xi1>, vector<2x32xf32>
    %364 = arith.select %309, %360, %308 : vector<2x32xi1>, vector<2x32xf32>
    %365 = vector.extract_strided_slice %7 {offsets = [12, 0], sizes = [2, 32], strides = [1, 1]} : vector<16x32xi1> to vector<2x32xi1>
    %366 = vector.extract_strided_slice %27 {offsets = [12, 0], sizes = [2, 128], strides = [1, 1]} : vector<16x128xf32> to vector<2x128xf32>
    %367 = arith.truncf %334 : vector<2x32xf32> to vector<2x32xbf16>
    %cst_73 = arith.constant dense<0.000000e+00> : vector<2x128xf32>
    %368 = tpu.matmul %367, %0, %cst_73 {dimension_numbers = #tpu.dot_dimension_numbers<[1], [0], [0], [1], [0, 0, 1, 1], [], []>} : vector<2x32xbf16>, vector<32x128xbf16>, vector<2x128xf32> -> vector<2x128xf32>
    %369 = arith.addf %366, %368 : vector<2x128xf32>
    %370 = vector.broadcast %16 : vector<1x128xf32> to vector<2x128xf32>
    %371 = arith.mulf %369, %370 : vector<2x128xf32>
    %372 = arith.negf %371 : vector<2x128xf32>
    %373 = math.exp %372 : vector<2x128xf32>
    %cst_74 = arith.constant 1.000000e+00 : f32
    %374 = vector.broadcast %cst_74 : f32 to vector<2x128xf32>
    %375 = arith.addf %374, %373 : vector<2x128xf32>
    %376 = arith.divf %374, %375 : vector<2x128xf32>
    %377 = vector.extract_strided_slice %376 {offsets = [0, 0], sizes = [2, 32], strides = [1, 1]} : vector<2x128xf32> to vector<2x32xf32>
    %378 = vector.extract_strided_slice %376 {offsets = [0, 32], sizes = [2, 32], strides = [1, 1]} : vector<2x128xf32> to vector<2x32xf32>
    %379 = vector.extract_strided_slice %376 {offsets = [0, 64], sizes = [2, 32], strides = [1, 1]} : vector<2x128xf32> to vector<2x32xf32>
    %cst_75 = arith.constant 2.000000e+00 : f32
    %380 = vector.broadcast %cst_75 : f32 to vector<2x32xf32>
    %381 = arith.mulf %380, %379 : vector<2x32xf32>
    %cst_76 = arith.constant 1.000000e+00 : f32
    %382 = vector.broadcast %cst_76 : f32 to vector<2x32xf32>
    %383 = arith.subf %381, %382 : vector<2x32xf32>
    %384 = vector.extract_strided_slice %376 {offsets = [0, 96], sizes = [2, 32], strides = [1, 1]} : vector<2x128xf32> to vector<2x32xf32>
    %385 = arith.mulf %378, %335 : vector<2x32xf32>
    %386 = arith.mulf %377, %383 : vector<2x32xf32>
    %387 = arith.addf %385, %386 : vector<2x32xf32>
    %388 = math.tanh %387 : vector<2x32xf32>
    %389 = arith.mulf %384, %388 : vector<2x32xf32>
    %390 = arith.select %365, %389, %334 : vector<2x32xi1>, vector<2x32xf32>
    %391 = arith.select %365, %387, %335 : vector<2x32xi1>, vector<2x32xf32>
    %392 = arith.truncf %390 : vector<2x32xf32> to vector<2x32xbf16>
    %cst_77 = arith.constant dense<0.000000e+00> : vector<2x128xf32>
    %393 = tpu.matmul %392, %1, %cst_77 {dimension_numbers = #tpu.dot_dimension_numbers<[1], [0], [0], [1], [0, 0, 1, 1], [], []>} : vector<2x32xbf16>, vector<32x128xbf16>, vector<2x128xf32> -> vector<2x128xf32>
    %394 = arith.truncf %363 : vector<2x32xf32> to vector<2x32xbf16>
    %cst_78 = arith.constant dense<0.000000e+00> : vector<2x128xf32>
    %395 = tpu.matmul %394, %2, %cst_78 {dimension_numbers = #tpu.dot_dimension_numbers<[1], [0], [0], [1], [0, 0, 1, 1], [], []>} : vector<2x32xbf16>, vector<32x128xbf16>, vector<2x128xf32> -> vector<2x128xf32>
    %396 = arith.addf %393, %395 : vector<2x128xf32>
    %397 = vector.broadcast %4 : vector<1x128xf32> to vector<2x128xf32>
    %398 = arith.addf %396, %397 : vector<2x128xf32>
    %399 = vector.broadcast %16 : vector<1x128xf32> to vector<2x128xf32>
    %400 = arith.mulf %398, %399 : vector<2x128xf32>
    %401 = arith.negf %400 : vector<2x128xf32>
    %402 = math.exp %401 : vector<2x128xf32>
    %cst_79 = arith.constant 1.000000e+00 : f32
    %403 = vector.broadcast %cst_79 : f32 to vector<2x128xf32>
    %404 = arith.addf %403, %402 : vector<2x128xf32>
    %405 = arith.divf %403, %404 : vector<2x128xf32>
    %406 = vector.extract_strided_slice %405 {offsets = [0, 0], sizes = [2, 32], strides = [1, 1]} : vector<2x128xf32> to vector<2x32xf32>
    %407 = vector.extract_strided_slice %405 {offsets = [0, 32], sizes = [2, 32], strides = [1, 1]} : vector<2x128xf32> to vector<2x32xf32>
    %408 = vector.extract_strided_slice %405 {offsets = [0, 64], sizes = [2, 32], strides = [1, 1]} : vector<2x128xf32> to vector<2x32xf32>
    %cst_80 = arith.constant 2.000000e+00 : f32
    %409 = vector.broadcast %cst_80 : f32 to vector<2x32xf32>
    %410 = arith.mulf %409, %408 : vector<2x32xf32>
    %cst_81 = arith.constant 1.000000e+00 : f32
    %411 = vector.broadcast %cst_81 : f32 to vector<2x32xf32>
    %412 = arith.subf %410, %411 : vector<2x32xf32>
    %413 = vector.extract_strided_slice %405 {offsets = [0, 96], sizes = [2, 32], strides = [1, 1]} : vector<2x128xf32> to vector<2x32xf32>
    %414 = arith.mulf %407, %364 : vector<2x32xf32>
    %415 = arith.mulf %406, %412 : vector<2x32xf32>
    %416 = arith.addf %414, %415 : vector<2x32xf32>
    %417 = math.tanh %416 : vector<2x32xf32>
    %418 = arith.mulf %413, %417 : vector<2x32xf32>
    %419 = arith.select %365, %418, %363 : vector<2x32xi1>, vector<2x32xf32>
    %420 = arith.select %365, %416, %364 : vector<2x32xi1>, vector<2x32xf32>
    %421 = vector.extract_strided_slice %7 {offsets = [14, 0], sizes = [2, 32], strides = [1, 1]} : vector<16x32xi1> to vector<2x32xi1>
    %422 = vector.extract_strided_slice %27 {offsets = [14, 0], sizes = [2, 128], strides = [1, 1]} : vector<16x128xf32> to vector<2x128xf32>
    %423 = arith.truncf %390 : vector<2x32xf32> to vector<2x32xbf16>
    %cst_82 = arith.constant dense<0.000000e+00> : vector<2x128xf32>
    %424 = tpu.matmul %423, %0, %cst_82 {dimension_numbers = #tpu.dot_dimension_numbers<[1], [0], [0], [1], [0, 0, 1, 1], [], []>} : vector<2x32xbf16>, vector<32x128xbf16>, vector<2x128xf32> -> vector<2x128xf32>
    %425 = arith.addf %422, %424 : vector<2x128xf32>
    %426 = vector.broadcast %16 : vector<1x128xf32> to vector<2x128xf32>
    %427 = arith.mulf %425, %426 : vector<2x128xf32>
    %428 = arith.negf %427 : vector<2x128xf32>
    %429 = math.exp %428 : vector<2x128xf32>
    %cst_83 = arith.constant 1.000000e+00 : f32
    %430 = vector.broadcast %cst_83 : f32 to vector<2x128xf32>
    %431 = arith.addf %430, %429 : vector<2x128xf32>
    %432 = arith.divf %430, %431 : vector<2x128xf32>
    %433 = vector.extract_strided_slice %432 {offsets = [0, 0], sizes = [2, 32], strides = [1, 1]} : vector<2x128xf32> to vector<2x32xf32>
    %434 = vector.extract_strided_slice %432 {offsets = [0, 32], sizes = [2, 32], strides = [1, 1]} : vector<2x128xf32> to vector<2x32xf32>
    %435 = vector.extract_strided_slice %432 {offsets = [0, 64], sizes = [2, 32], strides = [1, 1]} : vector<2x128xf32> to vector<2x32xf32>
    %cst_84 = arith.constant 2.000000e+00 : f32
    %436 = vector.broadcast %cst_84 : f32 to vector<2x32xf32>
    %437 = arith.mulf %436, %435 : vector<2x32xf32>
    %cst_85 = arith.constant 1.000000e+00 : f32
    %438 = vector.broadcast %cst_85 : f32 to vector<2x32xf32>
    %439 = arith.subf %437, %438 : vector<2x32xf32>
    %440 = vector.extract_strided_slice %432 {offsets = [0, 96], sizes = [2, 32], strides = [1, 1]} : vector<2x128xf32> to vector<2x32xf32>
    %441 = arith.mulf %434, %391 : vector<2x32xf32>
    %442 = arith.mulf %433, %439 : vector<2x32xf32>
    %443 = arith.addf %441, %442 : vector<2x32xf32>
    %444 = math.tanh %443 : vector<2x32xf32>
    %445 = arith.mulf %440, %444 : vector<2x32xf32>
    %446 = arith.select %421, %445, %390 : vector<2x32xi1>, vector<2x32xf32>
    %447 = arith.select %421, %443, %391 : vector<2x32xi1>, vector<2x32xf32>
    %448 = arith.truncf %446 : vector<2x32xf32> to vector<2x32xbf16>
    %cst_86 = arith.constant dense<0.000000e+00> : vector<2x128xf32>
    %449 = tpu.matmul %448, %1, %cst_86 {dimension_numbers = #tpu.dot_dimension_numbers<[1], [0], [0], [1], [0, 0, 1, 1], [], []>} : vector<2x32xbf16>, vector<32x128xbf16>, vector<2x128xf32> -> vector<2x128xf32>
    %450 = arith.truncf %419 : vector<2x32xf32> to vector<2x32xbf16>
    %cst_87 = arith.constant dense<0.000000e+00> : vector<2x128xf32>
    %451 = tpu.matmul %450, %2, %cst_87 {dimension_numbers = #tpu.dot_dimension_numbers<[1], [0], [0], [1], [0, 0, 1, 1], [], []>} : vector<2x32xbf16>, vector<32x128xbf16>, vector<2x128xf32> -> vector<2x128xf32>
    %452 = arith.addf %449, %451 : vector<2x128xf32>
    %453 = vector.broadcast %4 : vector<1x128xf32> to vector<2x128xf32>
    %454 = arith.addf %452, %453 : vector<2x128xf32>
    %455 = vector.broadcast %16 : vector<1x128xf32> to vector<2x128xf32>
    %456 = arith.mulf %454, %455 : vector<2x128xf32>
    %457 = arith.negf %456 : vector<2x128xf32>
    %458 = math.exp %457 : vector<2x128xf32>
    %cst_88 = arith.constant 1.000000e+00 : f32
    %459 = vector.broadcast %cst_88 : f32 to vector<2x128xf32>
    %460 = arith.addf %459, %458 : vector<2x128xf32>
    %461 = arith.divf %459, %460 : vector<2x128xf32>
    %462 = vector.extract_strided_slice %461 {offsets = [0, 0], sizes = [2, 32], strides = [1, 1]} : vector<2x128xf32> to vector<2x32xf32>
    %463 = vector.extract_strided_slice %461 {offsets = [0, 32], sizes = [2, 32], strides = [1, 1]} : vector<2x128xf32> to vector<2x32xf32>
    %464 = vector.extract_strided_slice %461 {offsets = [0, 64], sizes = [2, 32], strides = [1, 1]} : vector<2x128xf32> to vector<2x32xf32>
    %cst_89 = arith.constant 2.000000e+00 : f32
    %465 = vector.broadcast %cst_89 : f32 to vector<2x32xf32>
    %466 = arith.mulf %465, %464 : vector<2x32xf32>
    %cst_90 = arith.constant 1.000000e+00 : f32
    %467 = vector.broadcast %cst_90 : f32 to vector<2x32xf32>
    %468 = arith.subf %466, %467 : vector<2x32xf32>
    %469 = vector.extract_strided_slice %461 {offsets = [0, 96], sizes = [2, 32], strides = [1, 1]} : vector<2x128xf32> to vector<2x32xf32>
    %470 = arith.mulf %463, %420 : vector<2x32xf32>
    %471 = arith.mulf %462, %468 : vector<2x32xf32>
    %472 = arith.addf %470, %471 : vector<2x32xf32>
    %473 = math.tanh %472 : vector<2x32xf32>
    %474 = arith.mulf %469, %473 : vector<2x32xf32>
    %475 = arith.select %421, %474, %419 : vector<2x32xi1>, vector<2x32xf32>
    %476 = arith.select %421, %472, %420 : vector<2x32xi1>, vector<2x32xf32>
    %477 = arith.truncf %475 : vector<2x32xf32> to vector<2x32xbf16>
    %c0_91 = arith.constant 0 : index
    %c0_92 = arith.constant 0 : index
    %478 = vector.load %arg8[%c0_91, %c0_92] : memref<32x64xbf16, #tpu.memory_space<vmem>>, vector<32x64xbf16>
    %cst_93 = arith.constant dense<0.000000e+00> : vector<2x64xf32>
    %479 = tpu.matmul %477, %478, %cst_93 {dimension_numbers = #tpu.dot_dimension_numbers<[1], [0], [0], [1], [0, 0, 1, 1], [], []>} : vector<2x32xbf16>, vector<32x64xbf16>, vector<2x64xf32> -> vector<2x64xf32>
    %c0_94 = arith.constant 0 : index
    %c0_95 = arith.constant 0 : index
    %480 = vector.load %arg9[%c0_94, %c0_95] : memref<1x64xf32, #tpu.memory_space<vmem>>, vector<1x64xf32>
    %481 = vector.broadcast %480 : vector<1x64xf32> to vector<2x64xf32>
    %482 = arith.addf %479, %481 : vector<2x64xf32>
    %cst_96 = arith.constant 0.000000e+00 : f32
    %483 = vector.broadcast %cst_96 : f32 to vector<2x64xf32>
    %484 = arith.maximumf %482, %483 : vector<2x64xf32>
    %485 = arith.truncf %484 : vector<2x64xf32> to vector<2x64xbf16>
    %c0_97 = arith.constant 0 : index
    %c0_98 = arith.constant 0 : index
    %486 = vector.load %arg10[%c0_97, %c0_98] : memref<64x4xbf16, #tpu.memory_space<vmem>>, vector<64x4xbf16>
    %cst_99 = arith.constant dense<0.000000e+00> : vector<2x4xf32>
    %487 = tpu.matmul %485, %486, %cst_99 {dimension_numbers = #tpu.dot_dimension_numbers<[1], [0], [0], [1], [0, 0, 1, 1], [], []>} : vector<2x64xbf16>, vector<64x4xbf16>, vector<2x4xf32> -> vector<2x4xf32>
    %c0_100 = arith.constant 0 : index
    %c0_101 = arith.constant 0 : index
    %488 = vector.load %arg11[%c0_100, %c0_101] : memref<1x4xf32, #tpu.memory_space<vmem>>, vector<1x4xf32>
    %489 = vector.broadcast %488 : vector<1x4xf32> to vector<2x4xf32>
    %490 = arith.addf %487, %489 : vector<2x4xf32>
    %cst_102 = arith.constant dense<0xFF800000> : vector<2xf32>
    %491 = vector.multi_reduction <maximumf>, %490, %cst_102 [1] : vector<2x4xf32> to vector<2xf32>
    %492 = vector.shape_cast %491 : vector<2xf32> to vector<2x1xf32>
    %493 = vector.broadcast %492 : vector<2x1xf32> to vector<2x4xf32>
    %494 = arith.subf %490, %493 : vector<2x4xf32>
    %495 = math.exp %494 : vector<2x4xf32>
    %cst_103 = arith.constant dense<0.000000e+00> : vector<2xf32>
    %496 = vector.multi_reduction <add>, %495, %cst_103 [1] : vector<2x4xf32> to vector<2xf32>
    %497 = vector.shape_cast %496 : vector<2xf32> to vector<2x1xf32>
    %498 = math.log %497 : vector<2x1xf32>
    %499 = arith.addf %498, %492 : vector<2x1xf32>
    %500 = vector.broadcast %499 : vector<2x1xf32> to vector<2x4xf32>
    %501 = arith.subf %490, %500 : vector<2x4xf32>
    %cst_104 = arith.constant 0.000000e+00 : f32
    %502 = vector.broadcast %cst_104 : f32 to vector<2x124xf32>
    %503 = tpu.concatenate %446, %475, %447, %476, %501, %502 in 1 : vector<2x32xf32>, vector<2x32xf32>, vector<2x32xf32>, vector<2x32xf32>, vector<2x4xf32>, vector<2x124xf32> -> vector<2x256xf32>
    %c0_105 = arith.constant 0 : index
    %c0_106 = arith.constant 0 : index
    %504 = vector.load %arg12[%c0_105, %c0_106] : memref<2x256xf32, #tpu.memory_space<vmem>>, vector<2x256xf32>
    tpu.vector_store %arg12[%c0_105, %c0_106], %503 {strides = array<i32>} : memref<2x256xf32, #tpu.memory_space<vmem>>, vector<2x256xf32>,
    return
  }
}

</mosaic_0001>

<bundles_post_ra>
// kernel: neg.1
= control target key start
LH: loop header
LB: loop body
LE: loop exit
PB: predicated region body
PF: predicated region fallthrough
CT: control target
= control target key end

     0   :  { %s24_s0 = inlined_call_operand.vmem [shape: s32[2], index: 0, kind: input, shape index: {}]   ;;  %s25_s1 = inlined_call_operand.vmem [shape: s32[2], index: 1, kind: output, shape index: {}]  }
   0x1   :  { %v2_v0 = vld [vmem:[%s24_s0] sm:$0x1] }
   0x2   :  { %v5_v1 = vsub.s32 0, %v2_v0 }
   0x4   :  { %7 = vst [vmem:[%s25_s1] sm:$0x1] %v5_v1 }

// kernel: rnn_forward.1
= control target key start
LH: loop header
LB: loop body
LE: loop exit
PB: predicated region body
PF: predicated region fallthrough
CT: control target
= control target key end

     0   :  { %v1898_v0 = vmov 0   ;;  %v60_v7 = vlaneseq  ;;  %v1899_v11 = vmov 0.0   ;;  %vm100_vm2 = vcmask 261120   ;;  %s1902_s15 = smov 32   ;;  %s1903_s16 = smov 96   ;;  %s2488_s0 = inlined_call_operand.vmem [shape: s32[16,1], index: 0, kind: input, shape index: {}]   ;;  %s2489_s3 = inlined_call_operand.vmem [shape: bf16[32,128], index: 3, kind: input, shape index: {}]   ;;  %s2490_s2 = inlined_call_operand.vmem [shape: bf16[32,128], index: 2, kind: input, shape index: {}]   ;;  %s2491_s6 = inlined_call_operand.vmem [shape: f32[1,128], index: 6, kind: input, shape index: {}]   ;;  %s2492_s5 = inlined_call_operand.vmem [shape: bf16[32,128], index: 5, kind: input, shape index: {}]   ;;  %s2493_s4 = inlined_call_operand.vmem [shape: bf16[32,128], index: 4, kind: input, shape index: {}]   ;;  %s2494_s1 = inlined_call_operand.vmem [shape: f32[16,32], index: 1, kind: input, shape index: {}]   ;;  %s2495_s7 = inlined_call_operand.vmem [shape: f32[1,128], index: 7, kind: input, shape index: {}]   ;;  %s2496_s8 = inlined_call_operand.vmem [shape: bf16[32,64], index: 8, kind: input, shape index: {}]   ;;  %s2497_s9 = inlined_call_operand.vmem [shape: f32[1,64], index: 9, kind: input, shape index: {}]   ;;  %s2498_s11 = inlined_call_operand.vmem [shape: f32[1,4], index: 11, kind: input, shape index: {}]   ;;  %s2499_s10 = inlined_call_operand.vmem [shape: bf16[64,4], index: 10, kind: input, shape index: {}]   ;;  %s2500_s12 = inlined_call_operand.vmem [shape: f32[2,256], index: 12, kind: output, shape index: {}]  }
   0x1   :  { %1790 = vset.pattern.permute.xlu0 %v1898_v0  ;;  %v66_v1 = vld [vmem:[%s2488_s0] sm:$0xff]  ;;  %v1976_v2 = vld [vmem:[%s2489_s3 + $0x8] sm:$0xff]  ;;  %v1900_v20 = vmov 1.0  }
   0x2   :  { %69 = vperm.xlu0 %1790, %v66_v1   ;;  %139 = vmatpush.bf16.msra.mxu1 %v1976_v2  ;;  %v67_v3 = vld [vmem:[%s2488_s0 + $0x8] sm:$0xff]  ;;  %v1985_v4 = vld [vmem:[%s2489_s3] sm:$0xff]  ;;  %v61_v9 = vand.u32 127, %v60_v7 }
   0x3   :  { %v1777_v5 = vld [vmem:[%s2490_s2 + $0x8] sm:$0xff]  ;;  %v1776_v6 = vld [vmem:[%s2490_s2] sm:$0xff] }
   0x4   :  { %110 = vmatpush.bf16.msra.mxu0 %v1777_v5  ;;  %vm62_vm3 = vcmp.ge.s32.totalorder %v61_v9, 64  ;;  %vm63_vm4 = vcmp.lt.s32.totalorder %v61_v9, 96  ;;  %v2001_v17 = vld [vmem:[%s2491_s6] ss:$0 sm:$0xff]  ;;  %s1901_s6 = smov 64   ;;  %v2017_v45 = vld [vmem:[%s2492_s5 + $0x8] sm:$0xff] }
   0x5   :  { %vm64_vm5 = vmand %vm62_vm3, %vm63_vm4  ;;  %v2022_v46 = vld [vmem:[%s2493_s4 + $0x8] sm:$0xff]  ;;  %215 = vmatpush.bf16.msra.mxu2 %v2017_v45  ;;  %v2032_v49 = vld [vmem:[%s2494_s1] sm:$0xff] }
   0x6   :  { %140 = vmatpush.bf16.msra.mxu1 %v1985_v4  ;;  %v2006_v21 = vsel %vm64_vm5, 2.0, %v1900_v20  ;;  %243 = vmatpush.bf16.msra.mxu3 %v2022_v46  ;;  %vm58_vm10 = vcmp.gt.f32.partialorder %v2032_v49, 0.5  ;;  %v2046_v53 = vld [vmem:[%s2492_s5] sm:$0xff] }
   0x7   :  { %v2051_v54 = vld [vmem:[%s2493_s4] sm:$0xff] }
   0x8   :  { %111 = vmatpush.bf16.msra.mxu0 %v1776_v6  ;;  %v2085_v1 = vld [vmem:[%s2495_s7] ss:$0 sm:$0xff] }
   0x9   :  { %141 = vmatmul.bf16.vlgmr.msra.gmra.mxu1 %v1898_v0  ;;  %216 = vmatpush.bf16.msra.mxu2 %v2046_v53 }
   0xa   :  { %72 = vperm.xlu0 %1790, %v67_v3   ;;  %389 = vmatpush.bf16.msrb.mxu1 %v2017_v45 }
   0xb   :  { %244 = vmatpush.bf16.msra.mxu3 %v2051_v54 }
   0xc   :  { %309 = vmatpush.bf16.msrb.mxu0 %v1976_v2  ;;  %217 = vmatmul.bf16.vlgmr.msra.gmra.mxu2 %v1898_v0 }
   0xd   :  { %407 = vmatpush.bf16.msrb.mxu2 %v2022_v46 }
   0xe   :  { %390 = vmatpush.bf16.msrb.mxu1 %v2046_v53 }
   0xf   :  { %481 = vmatpush.bf16.msrb.mxu3 %v1976_v2 }
  0x10   :  { %310 = vmatpush.bf16.msrb.mxu0 %v1985_v4 }
  0x11   :  { %408 = vmatpush.bf16.msrb.mxu2 %v2051_v54 }
  0x12   :  { %581 = vmatpush.bf16.msra.mxu1 %v2022_v46 }
  0x13   :  { %482 = vmatpush.bf16.msrb.mxu3 %v1985_v4 }
  0x15   :  { %656 = vmatpush.bf16.msra.mxu2 %v1976_v2 }
  0x16   :  { %582 = vmatpush.bf16.msra.mxu1 %v2051_v54 }
  0x19   :  { %657 = vmatpush.bf16.msra.mxu2 %v1985_v4 }
  0x74   :  { %v70_v8 = vpop.permute.xlu0 %69 }
  0x75   :  { %vm74_vm0 = vcmp.eq.s32.totalorder %v61_v9, %v70_v8 }
  0x76   :  { %v1655_v12 = vsel %vm74_vm0, 1.0, %v1899_v11 }
  0x7c   :  { %v73_v10 = vpop.permute.xlu0 %72 }
  0x7d   :  { %vm75_vm1 = vcmp.eq.s32.totalorder %v61_v9, %v73_v10 }
  0x7e   :  { %v1656_v13 = vsel %vm75_vm1, 1.0, %v1899_v11 }
  0x7f   :  { %v80_v14 = vpack.c.bf16 %v1656_v13, %v1655_v12 }
  0x81   :  { %1665 = vmatmul.msk.bf16.vlgmr.msra.gmra.mxu0 %vm100_vm2, %v80_v14 }
  0x82   :  { %563 = vmatpush.bf16.msra.mxu0 %v2017_v45 }
  0x86   :  { %v142_v15 = vpop.f32.mrf.mxu1  ;;  %564 = vmatpush.bf16.msra.mxu0 %v2046_v53 }
  0x8e   :  { %v144_v16 = vpop.f32.mrf.mxu1 }
  0x8f   :  { %v218_v58 = vpop.f32.mrf.mxu2 }
  0x97   :  { %v220_v59 = vpop.f32.mrf.mxu2 }
  0xfe   :  { %v113_v18 = vpop.f32.mrf.mxu0 }
  0xff   :  { %v2004_v19 = vadd.f32 %v2001_v17, %v113_v18 }
 0x101   :  { %v146_v22 = vadd.f32 %v142_v15, %v2004_v19 }
 0x103   :  { %v147_v23 = vmul.f32 %v146_v22, %v2006_v21 }
 0x105   :  { %v1674_v24 = vmul.f32 -1.442695, %v147_v23 }
 0x106   :  { %v2078_v60 = vpop.f32.mrf.mxu0 }
 0x107   :  { %1795 = vpow2.f32 %v1674_v24 }
 0x10d   :  { %v1796_v25 = vpop.eup %1795 }
 0x10e   :  { %v151_v26 = vadd.f32 1.0, %v1796_v25 }
 0x110   :  { %1797 = vrcp.f32 %v151_v26  ;;  %v163_v30 = vand.u32 2147483648, %v151_v26  ;;  %v161_v32 = vand.u32 2147483647, %v151_v26  ;;  %vm157_vm7 = vweird.f32 %v151_v26 }
 0x112   :  { %v164_v34 = vor.u32 1.1754944e-38, %v163_v30  ;;  %vm162_vm9 = vcmp.eq.f32.partialorder %v161_v32, 8.507059e+37 }
 0x116   :  { %v1798_v27 = vpop.eup %1797 }
 0x117   :  { %v153_v28 = vmul.f32 %v1798_v27, %v151_v26  ;;  %vm158_vm6 = vweird.f32 %v1798_v27 }
 0x118   :  { %vm159_vm8 = vmor %vm157_vm7, %vm158_vm6 }
 0x119   :  { %v154_v29 = vsub.f32 1.0, %v153_v28 }
 0x11b   :  { %v155_v31 = vmul.f32 %v1798_v27, %v154_v29 }
 0x11d   :  { %v156_v33 = vadd.f32 %v1798_v27, %v155_v31 }
 0x11f   :  { %v160_v35 = vsel %vm159_vm8, %v1798_v27, %v156_v33 }
 0x120   :  { %v165_v36 = vsel %vm162_vm9, %v164_v34, %v160_v35 }
 0x121   :  { %v167_v37 = vmul.f32 2.0, %v165_v36  ;;  %v169_v41 = vmul.f32 0.0, %v165_v36 }
 0x123   :  { %v1675_v38 = vadd.f32 -1.0, %v167_v37 }
 0x125   :  { %171 = vrot.lane.b32.xlu1 %v1675_v38, %s1901_s6 }
 0x197   :  { %v172_v39 = vpop.permute.xlu1 %171 }
 0x198   :  { %v174_v40 = vmul.f32 %v172_v39, %v165_v36 }
 0x19a   :  { %176 = vrot.lane.b32.xlu1 %v174_v40, %s1902_s15 }
 0x20c   :  { %v177_v42 = vpop.permute.xlu1 %176 }
 0x20d   :  { %v179_v43 = vadd.f32 %v177_v42, %v169_v41 }
 0x20f   :  { %1799 = vtanh.f32 %v179_v43  ;;  %192 = vrot.lane.b32.xlu0 %v179_v43, %s1903_s16 }
 0x215   :  { %v1800_v44 = vpop.eup %1799 }
 0x216   :  { %182 = vrot.lane.b32.xlu2 %v1800_v44, %s1901_s6 }
 0x270   :  { %v183_v47 = vpop.permute.xlu2 %182 }
 0x271   :  { %v185_v48 = vmul.f32 %v183_v47, %v165_v36 }
 0x273   :  { %187 = vrot.lane.b32.xlu2 %v185_v48, %s1902_s15 }
 0x281   :  { %v193_v50 = vpop.permute.xlu0 %192 }
 0x282   :  { %v2037_v51 = vsel %vm58_vm10, %v193_v50, 0.0 }
 0x283   :  { %v343_v52 = vrot.slane %v2037_v51, 6 }
 0x285   :  { %344 = vrot.lane.b32.xlu0 %v343_v52, %s1902_s15 }
 0x2cd   :  { %v188_v55 = vpop.permute.xlu2 %187 }
 0x2ce   :  { %v2068_v56 = vsel %vm58_vm10, %v188_v55, 0.0 }
 0x2cf   :  { %v196_v57 = vpack.c.bf16 %v2068_v56, %v2068_v56 }
 0x2d1   :  { %1692 = vmatmul.msk.bf16.vlgmr.msra.gmra.mxu3 %vm100_vm2, %v196_v57  ;;  %1695 = vmatmul.msk.bf16.vlgmr.msrb.gmra.mxu0 %vm100_vm2, %v196_v57 }
 0x2d2   :  { %738 = vmatpush.bf16.msra.mxu3 %v2017_v45  ;;  %756 = vmatpush.bf16.msrb.mxu0 %v2022_v46 }
 0x2d6   :  { %739 = vmatpush.bf16.msra.mxu3 %v2046_v53  ;;  %757 = vmatpush.bf16.msrb.mxu0 %v2051_v54 }
 0x2f7   :  { %v345_v59 = vpop.permute.xlu0 %344 }
 0x34e   :  { %v312_v61 = vpop.f32.mrf.mxu0 }
 0x34f   :  { %v317_v62 = vrot.slane %v312_v61, 6 }
 0x351   :  { %v319_v63 = vadd.f32 %v317_v62, %v2004_v19 }
 0x353   :  { %v320_v0 = vmul.f32 %v319_v63, %v2006_v21 }
 0x354   :  { %v246_v3 = vpop.f32.mrf.mxu3 }
 0x355   :  { %v1696_v5 = vmul.f32 -1.442695, %v320_v0  ;;  %v247_v6 = vadd.f32 %v246_v3, %v218_v58 }
 0x356   :  { %v314_v7 = vpop.f32.mrf.mxu0 }
 0x357   :  { %1801 = vpow2.f32 %v1696_v5  ;;  %v253_v8 = vadd.f32 %v2085_v1, %v247_v6 }
 0x359   :  { %v254_v9 = vmul.f32 %v253_v8, %v2006_v21 }
 0x35b   :  { %v1693_v10 = vmul.f32 -1.442695, %v254_v9 }
 0x35c   :  { %v248_v11 = vpop.f32.mrf.mxu3 }
 0x35d   :  { %v1802_v12 = vpop.eup %1801  ;;  %1803 = vpow2.f32 %v1693_v10 }
 0x35e   :  { %v324_v13 = vadd.f32 1.0, %v1802_v12 }
 0x360   :  { %1805 = vrcp.f32 %v324_v13  ;;  %v336_v22 = vand.u32 2147483648, %v324_v13  ;;  %v334_v24 = vand.u32 2147483647, %v324_v13  ;;  %vm330_vm12 = vweird.f32 %v324_v13 }
 0x362   :  { %v337_v28 = vor.u32 1.1754944e-38, %v336_v22  ;;  %vm335_vm14 = vcmp.eq.f32.partialorder %v334_v24, 8.507059e+37 }
 0x363   :  { %v1804_v14 = vpop.eup %1803 }
 0x364   :  { %v258_v15 = vadd.f32 1.0, %v1804_v14 }
 0x366   :  { %v1806_v16 = vpop.eup %1805  ;;  %1807 = vrcp.f32 %v258_v15  ;;  %v270_v32 = vand.u32 2147483648, %v258_v15  ;;  %v268_v35 = vand.u32 2147483647, %v258_v15  ;;  %vm264_vm0 = vweird.f32 %v258_v15 }
 0x367   :  { %v326_v18 = vmul.f32 %v1806_v16, %v324_v13  ;;  %vm331_vm11 = vweird.f32 %v1806_v16  ;;  %v369_v13 = vrot.slane %v2068_v56, 6 }
 0x368   :  { %vm332_vm13 = vmor %vm330_vm12, %vm331_vm11  ;;  %v271_v38 = vor.u32 1.1754944e-38, %v270_v32  ;;  %vm269_vm3 = vcmp.eq.f32.partialorder %v268_v35, 8.507059e+37 }
 0x369   :  { %v327_v20 = vsub.f32 1.0, %v326_v18 }
 0x36b   :  { %v328_v23 = vmul.f32 %v1806_v16, %v327_v20 }
 0x36c   :  { %v1808_v25 = vpop.eup %1807 }
 0x36d   :  { %v329_v26 = vadd.f32 %v1806_v16, %v328_v23  ;;  %v260_v27 = vmul.f32 %v1808_v25, %v258_v15  ;;  %vm265_vm15 = vweird.f32 %v1808_v25 }
 0x36e   :  { %vm266_vm1 = vmor %vm264_vm0, %vm265_vm15 }
 0x36f   :  { %v333_v29 = vsel %vm332_vm13, %v1806_v16, %v329_v26  ;;  %v261_v30 = vsub.f32 1.0, %v260_v27 }
 0x370   :  { %v338_v31 = vsel %vm335_vm14, %v337_v28, %v333_v29 }
 0x371   :  { %v340_v33 = vmul.f32 2.0, %v338_v31  ;;  %v262_v34 = vmul.f32 %v1808_v25, %v261_v30  ;;  %v347_v61 = vmul.f32 %v345_v59, %v338_v31 }
 0x373   :  { %v1697_v36 = vadd.f32 -1.0, %v340_v33  ;;  %v263_v37 = vadd.f32 %v1808_v25, %v262_v34 }
 0x375   :  { %349 = vrot.lane.b32.xlu1 %v1697_v36, %s1901_s6  ;;  %v267_v39 = vsel %vm266_vm1, %v1808_v25, %v263_v37 }
 0x376   :  { %v272_v40 = vsel %vm269_vm3, %v271_v38, %v267_v39 }
 0x377   :  { %v274_v41 = vmul.f32 2.0, %v272_v40  ;;  %v276_v50 = vmul.f32 0.0, %v272_v40 }
 0x379   :  { %v1694_v42 = vadd.f32 -1.0, %v274_v41 }
 0x37b   :  { %278 = vrot.lane.b32.xlu2 %v1694_v42, %s1901_s6 }
 0x3d5   :  { %v279_v43 = vpop.permute.xlu2 %278 }
 0x3d6   :  { %v281_v44 = vmul.f32 %v279_v43, %v272_v40 }
 0x3d8   :  { %283 = vrot.lane.b32.xlu2 %v281_v44, %s1902_s15 }
 0x3e7   :  { %v350_v47 = vpop.permute.xlu1 %349 }
 0x3e8   :  { %v352_v48 = vmul.f32 %v350_v47, %v338_v31 }
 0x3ea   :  { %354 = vrot.lane.b32.xlu1 %v352_v48, %s1902_s15 }
 0x432   :  { %v284_v55 = vpop.permute.xlu2 %283 }
 0x433   :  { %v286_v57 = vadd.f32 %v284_v55, %v276_v50 }
 0x435   :  { %1809 = vtanh.f32 %v286_v57 }
 0x43b   :  { %v1810_v58 = vpop.eup %1809 }
 0x43c   :  { %289 = vrot.lane.b32.xlu1 %v1810_v58, %s1901_s6 }
 0x444   :  { %299 = vrot.lane.b32.xlu1 %v286_v57, %s1903_s16 }
 0x45c   :  { %v355_v62 = vpop.permute.xlu1 %354 }
 0x45d   :  { %v357_v63 = vadd.f32 %v355_v62, %v347_v61 }
 0x45f   :  { %1811 = vtanh.f32 %v357_v63 }
 0x465   :  { %v1812_v0 = vpop.eup %1811 }
 0x466   :  { %360 = vrot.lane.b32.xlu0 %v1812_v0, %s1901_s6 }
 0x4ae   :  { %v290_v3 = vpop.permute.xlu1 %289 }
 0x4af   :  { %v292_v5 = vmul.f32 %v290_v3, %v272_v40 }
 0x4b1   :  { %294 = vrot.lane.b32.xlu0 %v292_v5, %s1902_s15 }
 0x4b6   :  { %v300_v8 = vpop.permute.xlu1 %299 }
 0x4b7   :  { %v2101_v9 = vsel %vm58_vm10, %v300_v8, 0.0 }
 0x4d8   :  { %v361_v6 = vpop.permute.xlu0 %360 }
 0x4d9   :  { %v363_v7 = vmul.f32 %v361_v6, %v338_v31 }
 0x4db   :  { %365 = vrot.lane.b32.xlu2 %v363_v7, %s1902_s15 }
 0x4e3   :  { %373 = vrot.lane.b32.xlu2 %v357_v63, %s1903_s16 }
 0x4eb   :  { %438 = vrot.lane.b32.xlu2 %v2101_v9, %s1902_s15 }
 0x523   :  { %v295_v10 = vpop.permute.xlu0 %294 }
 0x524   :  { %v2107_v11 = vsel %vm58_vm10, %v295_v10, 0.0 }
 0x525   :  { %v379_v12 = vpack.c.bf16 %v2107_v11, %v2107_v11 }
 0x527   :  { %1698 = vmatmul.msk.bf16.vlgmr.msrb.gmra.mxu1 %vm100_vm2, %v379_v12 }
 0x528   :  { %831 = vmatpush.bf16.msrb.mxu1 %v1976_v2 }
 0x52c   :  { %832 = vmatpush.bf16.msrb.mxu1 %v1985_v4 }
 0x535   :  { %v366_v14 = vpop.permute.xlu2 %365 }
 0x536   :  { %v2117_v15 = vsel %vm58_vm10, %v366_v14, %v369_v13 }
 0x537   :  { %v378_v16 = vpack.c.bf16 %v2117_v15, %v2117_v15 }
 0x539   :  { %v397_v18 = vrot.slane %v378_v16, 1 }
 0x53b   :  { %1699 = vmatmul.msk.bf16.vlgmr.msrb.gmra.mxu2 %vm100_vm2, %v397_v18  ;;  %1702 = vmatmul.msk.bf16.vlgmr.msrb.gmra.mxu3 %vm100_vm2, %v397_v18 }
 0x53c   :  { %910 = vmatpush.bf16.msrb.mxu2 %v2017_v45  ;;  %926 = vmatpush.bf16.msrb.mxu3 %v2022_v46 }
 0x53d   :  { %v374_v12 = vpop.permute.xlu2 %373 }
 0x53e   :  { %v2137_v13 = vsel %vm58_vm10, %v374_v12, %v343_v52 }
 0x53f   :  { %v515_v14 = vrot.slane %v2137_v13, 6 }
 0x540   :  { %927 = vmatpush.bf16.msrb.mxu3 %v2051_v54  ;;  %911 = vmatpush.bf16.msrb.mxu2 %v2046_v53 }
 0x5a4   :  { %v392_v56 = vpop.f32.mrf.mxu1 }
 0x5ac   :  { %v394_v20 = vpop.f32.mrf.mxu1 }
 0x5be   :  { %v410_v22 = vpop.f32.mrf.mxu2  ;;  %v484_v23 = vpop.f32.mrf.mxu3 }
 0x5bf   :  { %v411_v24 = vadd.f32 %v410_v22, %v392_v56  ;;  %v489_v25 = vrot.slane %v484_v23, 4  ;;  %v439_v22 = vpop.permute.xlu2 %438 }
 0x5c1   :  { %v414_v26 = vadd.f32 %v2085_v1, %v411_v24  ;;  %v491_v27 = vadd.f32 %v489_v25, %v2004_v19 }
 0x5c3   :  { %v415_v28 = vmul.f32 %v414_v26, %v2006_v21  ;;  %v492_v29 = vmul.f32 %v491_v27, %v2006_v21 }
 0x5c5   :  { %v1700_v30 = vmul.f32 -1.442695, %v415_v28  ;;  %v1703_v31 = vmul.f32 -1.442695, %v492_v29 }
 0x5c6   :  { %v412_v32 = vpop.f32.mrf.mxu2  ;;  %v486_v33 = vpop.f32.mrf.mxu3 }
 0x5c7   :  { %1813 = vpow2.f32 %v1700_v30 }
 0x5c8   :  { %1815 = vpow2.f32 %v1703_v31 }
 0x5cd   :  { %v1814_v34 = vpop.eup %1813 }
 0x5ce   :  { %v1816_v35 = vpop.eup %1815  ;;  %v419_v36 = vadd.f32 1.0, %v1814_v34 }
 0x5cf   :  { %v496_v37 = vadd.f32 1.0, %v1816_v35 }
 0x5d0   :  { %1817 = vrcp.f32 %v419_v36  ;;  %v431_v44 = vand.u32 2147483648, %v419_v36  ;;  %v429_v50 = vand.u32 2147483647, %v419_v36  ;;  %vm425_vm6 = vweird.f32 %v419_v36 }
 0x5d1   :  { %1819 = vrcp.f32 %v496_v37  ;;  %v508_v47 = vand.u32 2147483648, %v496_v37  ;;  %v506_v57 = vand.u32 2147483647, %v496_v37  ;;  %vm502_vm7 = vweird.f32 %v496_v37 }
 0x5d2   :  { %v432_v61 = vor.u32 1.1754944e-38, %v431_v44  ;;  %vm430_vm11 = vcmp.eq.f32.partialorder %v429_v50, 8.507059e+37 }
 0x5d3   :  { %v509_v62 = vor.u32 1.1754944e-38, %v508_v47  ;;  %vm507_vm12 = vcmp.eq.f32.partialorder %v506_v57, 8.507059e+37 }
 0x5d6   :  { %v1818_v38 = vpop.eup %1817 }
 0x5d7   :  { %v1820_v39 = vpop.eup %1819  ;;  %v421_v40 = vmul.f32 %v1818_v38, %v419_v36  ;;  %vm426_vm4 = vweird.f32 %v1818_v38  ;;  %v541_v36 = vrot.slane %v2117_v15, 6 }
 0x5d8   :  { %v498_v41 = vmul.f32 %v1820_v39, %v496_v37  ;;  %vm503_vm5 = vweird.f32 %v1820_v39  ;;  %vm427_vm8 = vmor %vm425_vm6, %vm426_vm4  ;;  %v464_v37 = vrot.slane %v2107_v11, 6 }
 0x5d9   :  { %v422_v42 = vsub.f32 1.0, %v421_v40  ;;  %vm504_vm9 = vmor %vm502_vm7, %vm503_vm5 }
 0x5da   :  { %v499_v43 = vsub.f32 1.0, %v498_v41 }
 0x5db   :  { %v423_v48 = vmul.f32 %v1818_v38, %v422_v42 }
 0x5dc   :  { %v500_v55 = vmul.f32 %v1820_v39, %v499_v43 }
 0x5dd   :  { %v424_v58 = vadd.f32 %v1818_v38, %v423_v48 }
 0x5de   :  { %v501_v59 = vadd.f32 %v1820_v39, %v500_v55 }
 0x5df   :  { %v428_v63 = vsel %vm427_vm8, %v1818_v38, %v424_v58 }
 0x5e0   :  { %v505_v0 = vsel %vm504_vm9, %v1820_v39, %v501_v59  ;;  %v433_v3 = vsel %vm430_vm11, %v432_v61, %v428_v63 }
 0x5e1   :  { %v510_v5 = vsel %vm507_vm12, %v509_v62, %v505_v0  ;;  %v435_v6 = vmul.f32 2.0, %v433_v3  ;;  %v441_v26 = vmul.f32 %v439_v22, %v433_v3 }
 0x5e2   :  { %v512_v7 = vmul.f32 2.0, %v510_v5 }
 0x5e3   :  { %v1701_v8 = vadd.f32 -1.0, %v435_v6 }
 0x5e4   :  { %v1704_v10 = vadd.f32 -1.0, %v512_v7 }
 0x5e5   :  { %443 = vrot.lane.b32.xlu0 %v1701_v8, %s1901_s6 }
 0x5e6   :  { %521 = vrot.lane.b32.xlu1 %v1704_v10, %s1901_s6 }
 0x5ee   :  { %516 = vrot.lane.b32.xlu1 %v515_v14, %s1902_s15 }
 0x657   :  { %v444_v16 = vpop.permute.xlu0 %443 }
 0x658   :  { %v522_v18 = vpop.permute.xlu1 %521  ;;  %v446_v56 = vmul.f32 %v444_v16, %v433_v3 }
 0x659   :  { %v524_v20 = vmul.f32 %v522_v18, %v510_v5 }
 0x65a   :  { %448 = vrot.lane.b32.xlu0 %v446_v56, %s1902_s15 }
 0x65b   :  { %526 = vrot.lane.b32.xlu2 %v524_v20, %s1902_s15 }
 0x660   :  { %v517_v51 = vpop.permute.xlu1 %516 }
 0x661   :  { %v519_v23 = vmul.f32 %v517_v51, %v510_v5 }
 0x6b5   :  { %v527_v24 = vpop.permute.xlu2 %526 }
 0x6b6   :  { %v529_v52 = vadd.f32 %v527_v24, %v519_v23 }
 0x6b8   :  { %1821 = vtanh.f32 %v529_v52 }
 0x6be   :  { %v1822_v25 = vpop.eup %1821 }
 0x6bf   :  { %532 = vrot.lane.b32.xlu1 %v1822_v25, %s1901_s6 }
 0x6cc   :  { %v449_v27 = vpop.permute.xlu0 %448 }
 0x6cd   :  { %v451_v28 = vadd.f32 %v449_v27, %v441_v26 }
 0x6cf   :  { %1823 = vtanh.f32 %v451_v28  ;;  %v468_v29 = vrot.slane %v451_v28, 6 }
 0x6d1   :  { %469 = vrot.lane.b32.xlu1 %v468_v29, %s1903_s16 }
 0x6d5   :  { %v1824_v30 = vpop.eup %1823 }
 0x6d6   :  { %454 = vrot.lane.b32.xlu0 %v1824_v30, %s1901_s6 }
 0x731   :  { %v533_v31 = vpop.permute.xlu1 %532 }
 0x732   :  { %v535_v32 = vmul.f32 %v533_v31, %v510_v5 }
 0x734   :  { %537 = vrot.lane.b32.xlu0 %v535_v32, %s1902_s15 }
 0x73c   :  { %545 = vrot.lane.b32.xlu0 %v529_v52, %s1903_s16 }
 0x748   :  { %v455_v33 = vpop.permute.xlu0 %454 }
 0x749   :  { %v457_v34 = vmul.f32 %v455_v33, %v433_v3 }
 0x74b   :  { %v459_v35 = vrot.slane %v457_v34, 6 }
 0x74d   :  { %460 = vrot.lane.b32.xlu2 %v459_v35, %s1902_s15  ;;  %v470_v35 = vpop.permute.xlu1 %469 }
 0x7a6   :  { %v538_v38 = vpop.permute.xlu0 %537 }
 0x7a7   :  { %v2155_v39 = vsel %vm58_vm10, %v538_v38, %v541_v36  ;;  %v461_v40 = vpop.permute.xlu2 %460 }
 0x7a8   :  { %v550_v41 = vpack.c.bf16 %v2155_v39, %v2155_v39  ;;  %v2161_v42 = vsel %vm58_vm10, %v461_v40, %v464_v37  ;;  %v472_v37 = vrot.slane %v2101_v9, 6 }
 0x7a9   :  { %v551_v43 = vpack.c.bf16 %v2161_v42, %v2161_v42 }
 0x7aa   :  { %v571_v44 = vrot.slane %v550_v41, 2  ;;  %v474_v40 = vsel %vm58_vm10, %v470_v35, %v472_v37 }
 0x7ab   :  { %v553_v15 = vrot.slane %v551_v43, 1 }
 0x7ac   :  { %1706 = vmatmul.msk.bf16.vlgmr.msra.gmra.mxu1 %vm100_vm2, %v571_v44  ;;  %1709 = vmatmul.msk.bf16.vlgmr.msra.gmra.mxu2 %vm100_vm2, %v571_v44  ;;  %v612_v44 = vrot.slane %v474_v40, 2 }
 0x7ad   :  { %1705 = vmatmul.msk.bf16.vlgmr.msra.gmra.mxu0 %vm100_vm2, %v553_v15  ;;  %1096 = vmatpush.bf16.msra.mxu2 %v2022_v46 }
 0x7ae   :  { %998 = vmatpush.bf16.msra.mxu0 %v1976_v2  ;;  %1078 = vmatpush.bf16.msra.mxu1 %v2017_v45  ;;  %v546_v43 = vpop.permute.xlu0 %545 }
 0x7af   :  { %v2187_v15 = vsel %vm58_vm10, %v546_v43, %v515_v14 }
 0x7b1   :  { %1097 = vmatpush.bf16.msra.mxu2 %v2051_v54 }
 0x7b2   :  { %999 = vmatpush.bf16.msra.mxu0 %v1985_v4  ;;  %1079 = vmatpush.bf16.msra.mxu1 %v2046_v53 }
 0x829   :  { %v584_v11 = vpop.f32.mrf.mxu1 }
 0x82a   :  { %v566_v47 = vpop.f32.mrf.mxu0 }
 0x82b   :  { %v585_v48 = vadd.f32 %v584_v11, %v566_v47  ;;  %v690_v11 = vrot.slane %v2187_v15, 6 }
 0x82d   :  { %v588_v50 = vadd.f32 %v2085_v1, %v585_v48 }
 0x82f   :  { %v589_v55 = vmul.f32 %v588_v50, %v2006_v21  ;;  %v659_v57 = vpop.f32.mrf.mxu2 }
 0x830   :  { %v664_v58 = vrot.slane %v659_v57, 2 }
 0x831   :  { %v1707_v59 = vmul.f32 -1.442695, %v589_v55  ;;  %v586_v61 = vpop.f32.mrf.mxu1 }
 0x832   :  { %v666_v62 = vadd.f32 %v664_v58, %v2004_v19  ;;  %v568_v63 = vpop.f32.mrf.mxu0 }
 0x833   :  { %1825 = vpow2.f32 %v1707_v59 }
 0x834   :  { %v667_v0 = vmul.f32 %v666_v62, %v2006_v21 }
 0x836   :  { %v1710_v3 = vmul.f32 -1.442695, %v667_v0 }
 0x837   :  { %v661_v5 = vpop.f32.mrf.mxu2 }
 0x838   :  { %1827 = vpow2.f32 %v1710_v3 }
 0x839   :  { %v1826_v6 = vpop.eup %1825 }
 0x83a   :  { %v593_v7 = vadd.f32 1.0, %v1826_v6 }
 0x83c   :  { %1829 = vrcp.f32 %v593_v7  ;;  %v605_v56 = vand.u32 2147483648, %v593_v7  ;;  %v603_v19 = vand.u32 2147483647, %v593_v7  ;;  %vm599_vm14 = vweird.f32 %v593_v7 }
 0x83e   :  { %v1828_v8 = vpop.eup %1827  ;;  %v606_v24 = vor.u32 1.1754944e-38, %v605_v56  ;;  %vm604_vm0 = vcmp.eq.f32.partialorder %v603_v19, 8.507059e+37 }
 0x83f   :  { %v671_v10 = vadd.f32 1.0, %v1828_v8 }
 0x841   :  { %1831 = vrcp.f32 %v671_v10  ;;  %v683_v26 = vand.u32 2147483648, %v671_v10  ;;  %v681_v29 = vand.u32 2147483647, %v671_v10  ;;  %vm677_vm3 = vweird.f32 %v671_v10 }
 0x842   :  { %v1830_v12 = vpop.eup %1829 }
 0x843   :  { %v595_v16 = vmul.f32 %v1830_v12, %v593_v7  ;;  %vm600_vm13 = vweird.f32 %v1830_v12  ;;  %v684_v33 = vor.u32 1.1754944e-38, %v683_v26  ;;  %vm682_vm5 = vcmp.eq.f32.partialorder %v681_v29, 8.507059e+37 }
 0x844   :  { %vm601_vm15 = vmor %vm599_vm14, %vm600_vm13 }
 0x845   :  { %v596_v18 = vsub.f32 1.0, %v595_v16  ;;  %v647_v16 = vrot.slane %v474_v40, 6 }
 0x847   :  { %v1832_v20 = vpop.eup %1831  ;;  %v597_v22 = vmul.f32 %v1830_v12, %v596_v18 }
 0x848   :  { %v673_v51 = vmul.f32 %v1832_v20, %v671_v10  ;;  %vm678_vm1 = vweird.f32 %v1832_v20 }
 0x849   :  { %v598_v23 = vadd.f32 %v1830_v12, %v597_v22  ;;  %vm679_vm4 = vmor %vm677_vm3, %vm678_vm1 }
 0x84a   :  { %v674_v52 = vsub.f32 1.0, %v673_v51 }
 0x84b   :  { %v602_v25 = vsel %vm601_vm15, %v1830_v12, %v598_v23 }
 0x84c   :  { %v607_v27 = vsel %vm604_vm0, %v606_v24, %v602_v25  ;;  %v675_v28 = vmul.f32 %v1832_v20, %v674_v52  ;;  %v716_v24 = vrot.slane %v2155_v39, 6  ;;  %v2233_v39 = vadd.f32 %v2001_v17, %v2078_v60 }
 0x84d   :  { %v609_v30 = vmul.f32 2.0, %v607_v27 }
 0x84e   :  { %v676_v31 = vadd.f32 %v1832_v20, %v675_v28 }
 0x84f   :  { %v1708_v32 = vadd.f32 -1.0, %v609_v30 }
 0x850   :  { %v680_v34 = vsel %vm679_vm4, %v1832_v20, %v676_v31  ;;  %v639_v20 = vrot.slane %v2161_v42, 6 }
 0x851   :  { %618 = vrot.lane.b32.xlu2 %v1708_v32, %s1901_s6  ;;  %v685_v36 = vsel %vm682_vm5, %v684_v33, %v680_v34 }
 0x852   :  { %v687_v38 = vmul.f32 2.0, %v685_v36 }
 0x854   :  { %v1711_v41 = vadd.f32 -1.0, %v687_v38 }
 0x856   :  { %696 = vrot.lane.b32.xlu1 %v1711_v41, %s1901_s6 }
 0x859   :  { %613 = vrot.lane.b32.xlu2 %v612_v44, %s1902_s15 }
 0x85e   :  { %691 = vrot.lane.b32.xlu1 %v690_v11, %s1902_s15 }
 0x8ab   :  { %v619_v9 = vpop.permute.xlu2 %618 }
 0x8ac   :  { %v621_v47 = vmul.f32 %v619_v9, %v607_v27 }
 0x8ae   :  { %623 = vrot.lane.b32.xlu0 %v621_v47, %s1902_s15 }
 0x8b3   :  { %v614_v13 = vpop.permute.xlu2 %613 }
 0x8b4   :  { %v616_v55 = vmul.f32 %v614_v13, %v607_v27 }
 0x8c8   :  { %v697_v48 = vpop.permute.xlu1 %696 }
 0x8c9   :  { %v699_v50 = vmul.f32 %v697_v48, %v685_v36 }
 0x8cb   :  { %701 = vrot.lane.b32.xlu2 %v699_v50, %s1902_s15 }
 0x8d0   :  { %v692_v57 = vpop.permute.xlu1 %691 }
 0x8d1   :  { %v694_v59 = vmul.f32 %v692_v57, %v685_v36 }
 0x920   :  { %v624_v14 = vpop.permute.xlu0 %623 }
 0x921   :  { %v626_v58 = vadd.f32 %v624_v14, %v616_v55 }
 0x923   :  { %1833 = vtanh.f32 %v626_v58  ;;  %v643_v3 = vrot.slane %v626_v58, 4 }
 0x925   :  { %v702_v61 = vpop.permute.xlu2 %701 }
 0x926   :  { %v704_v62 = vadd.f32 %v702_v61, %v694_v59 }
 0x928   :  { %1835 = vtanh.f32 %v704_v62 }
 0x929   :  { %v1834_v63 = vpop.eup %1833 }
 0x92a   :  { %629 = vrot.lane.b32.xlu0 %v1834_v63, %s1901_s6 }
 0x92e   :  { %v1836_v0 = vpop.eup %1835 }
 0x92f   :  { %707 = vrot.lane.b32.xlu1 %v1836_v0, %s1901_s6 }
 0x937   :  { %644 = vrot.lane.b32.xlu1 %v643_v3, %s1903_s16 }
 0x99c   :  { %v630_v5 = vpop.permute.xlu0 %629 }
 0x99d   :  { %v632_v6 = vmul.f32 %v630_v5, %v607_v27 }
 0x99f   :  { %v634_v7 = vrot.slane %v632_v6, 4 }
 0x9a1   :  { %v708_v8 = vpop.permute.xlu1 %707  ;;  %635 = vrot.lane.b32.xlu2 %v634_v7, %s1902_s15 }
 0x9a2   :  { %v710_v10 = vmul.f32 %v708_v8, %v685_v36 }
 0x9a4   :  { %712 = vrot.lane.b32.xlu0 %v710_v10, %s1902_s15 }
 0x9a9   :  { %v645_v12 = vpop.permute.xlu1 %644  ;;  %720 = vrot.lane.b32.xlu2 %v704_v62, %s1903_s16 }
 0x9aa   :  { %v2204_v18 = vsel %vm58_vm10, %v645_v12, %v647_v16 }
 0x9ab   :  { %v787_v56 = vrot.slane %v2204_v18, 4 }
 0x9b1   :  { %788 = vrot.lane.b32.xlu2 %v787_v56, %s1902_s15 }
 0x9fb   :  { %v636_v22 = vpop.permute.xlu2 %635 }
 0x9fc   :  { %v2211_v19 = vsel %vm58_vm10, %v636_v22, %v639_v20 }
 0x9fd   :  { %v726_v51 = vpack.c.bf16 %v2211_v19, %v2211_v19 }
 0x9ff   :  { %v728_v23 = vrot.slane %v726_v51, 2 }
 0xa01   :  { %1712 = vmatmul.msk.bf16.vlgmr.msra.gmra.mxu3 %vm100_vm2, %v728_v23 }
 0xa02   :  { %1170 = vmatpush.bf16.msra.mxu3 %v1976_v2 }
 0xa03   :  { %v721_v12 = vpop.permute.xlu2 %720 }
 0xa04   :  { %v2245_v56 = vsel %vm58_vm10, %v721_v12, %v690_v11 }
 0xa05   :  { %v862_v20 = vrot.slane %v2245_v56, 6 }
 0xa06   :  { %1171 = vmatpush.bf16.msra.mxu3 %v1985_v4 }
 0xa16   :  { %v713_v52 = vpop.permute.xlu0 %712 }
 0xa17   :  { %v2221_v42 = vsel %vm58_vm10, %v713_v52, %v716_v24  ;;  %v789_v52 = vpop.permute.xlu2 %788 }
 0xa18   :  { %v725_v25 = vpack.c.bf16 %v2221_v42, %v2221_v42 }
 0xa1a   :  { %v746_v26 = vrot.slane %v725_v25, 3 }
 0xa1c   :  { %1713 = vmatmul.msk.bf16.vlgmr.msrb.gmra.mxu0 %vm100_vm2, %v746_v26  ;;  %1716 = vmatmul.msk.bf16.vlgmr.msrb.gmra.mxu1 %vm100_vm2, %v746_v26 }
 0xa1d   :  { %1270 = vmatpush.bf16.msrb.mxu1 %v2022_v46  ;;  %1252 = vmatpush.bf16.msrb.mxu0 %v2017_v45 }
 0xa21   :  { %1271 = vmatpush.bf16.msrb.mxu1 %v2051_v54  ;;  %1253 = vmatpush.bf16.msrb.mxu0 %v2046_v53 }
 0xa84   :  { %v741_v2 = vpop.f32.mrf.mxu3 }
 0xa8c   :  { %v743_v4 = vpop.f32.mrf.mxu3 }
 0xa99   :  { %v759_v27 = vpop.f32.mrf.mxu0  ;;  %v834_v28 = vpop.f32.mrf.mxu1 }
 0xa9a   :  { %v760_v29 = vadd.f32 %v759_v27, %v741_v2  ;;  %v838_v30 = vadd.f32 %v834_v28, %v2233_v39 }
 0xa9c   :  { %v763_v31 = vadd.f32 %v2085_v1, %v760_v29  ;;  %v839_v32 = vmul.f32 %v838_v30, %v2006_v21 }
 0xa9e   :  { %v764_v33 = vmul.f32 %v763_v31, %v2006_v21  ;;  %v1717_v34 = vmul.f32 -1.442695, %v839_v32 }
 0xaa0   :  { %v1714_v35 = vmul.f32 -1.442695, %v764_v33  ;;  %1837 = vpow2.f32 %v1717_v34 }
 0xaa1   :  { %v761_v36 = vpop.f32.mrf.mxu0  ;;  %v836_v37 = vpop.f32.mrf.mxu1 }
 0xaa2   :  { %1839 = vpow2.f32 %v1714_v35  ;;  %v2262_v36 = vld [vmem:[%s2494_s1 + $0x8] sm:$0xff]  ;;  %v888_v37 = vrot.slane %v2221_v42, 6 }
 0xaa3   :  { %vm59_vm15 = vcmp.gt.f32.partialorder %v2262_v36, 0.5  ;;  %v1780_v36 = vld [vmem:[%s2499_s10] sm:$0xff] }
 0xaa6   :  { %v1838_v38 = vpop.eup %1837 }
 0xaa7   :  { %v843_v17 = vadd.f32 1.0, %v1838_v38 }
 0xaa8   :  { %v1840_v60 = vpop.eup %1839 }
 0xaa9   :  { %v768_v40 = vadd.f32 1.0, %v1840_v60  ;;  %1841 = vrcp.f32 %v843_v17  ;;  %v855_v48 = vand.u32 2147483648, %v843_v17  ;;  %v853_v13 = vand.u32 2147483647, %v843_v17 }
 0xaaa   :  { %vm849_vm7 = vweird.f32 %v843_v17 }
 0xaab   :  { %1843 = vrcp.f32 %v768_v40  ;;  %v780_v14 = vand.u32 2147483648, %v768_v40  ;;  %v778_v59 = vand.u32 2147483647, %v768_v40  ;;  %v856_v61 = vor.u32 1.1754944e-38, %v855_v48 }
 0xaac   :  { %vm854_vm11 = vcmp.eq.f32.partialorder %v853_v13, 8.507059e+37  ;;  %vm774_vm12 = vweird.f32 %v768_v40 }
 0xaad   :  { %v781_v3 = vor.u32 1.1754944e-38, %v780_v14  ;;  %vm779_vm14 = vcmp.eq.f32.partialorder %v778_v59, 8.507059e+37 }
 0xaaf   :  { %v1842_v41 = vpop.eup %1841 }
 0xab0   :  { %v845_v43 = vmul.f32 %v1842_v41, %v843_v17  ;;  %vm850_vm6 = vweird.f32 %v1842_v41 }
 0xab1   :  { %v1844_v44 = vpop.eup %1843  ;;  %vm851_vm9 = vmor %vm849_vm7, %vm850_vm6 }
 0xab2   :  { %v846_v9 = vsub.f32 1.0, %v845_v43  ;;  %v770_v47 = vmul.f32 %v1844_v44, %v768_v40  ;;  %vm775_vm8 = vweird.f32 %v1844_v44  ;;  %v814_v40 = vrot.slane %v2211_v19, 6  ;;  %v1895_v19 = vld [vmem:[%s2489_s3 + $0x8] sm:$0xff] }
 0xab3   :  { %vm776_vm13 = vmor %vm774_vm12, %vm775_vm8 }
 0xab4   :  { %v847_v50 = vmul.f32 %v1842_v41, %v846_v9  ;;  %v771_v55 = vsub.f32 1.0, %v770_v47 }
 0xab6   :  { %v848_v57 = vadd.f32 %v1842_v41, %v847_v50  ;;  %v772_v58 = vmul.f32 %v1844_v44, %v771_v55 }
 0xab8   :  { %v852_v62 = vsel %vm851_vm9, %v1842_v41, %v848_v57  ;;  %v773_v63 = vadd.f32 %v1844_v44, %v772_v58 }
 0xab9   :  { %v857_v0 = vsel %vm854_vm11, %v856_v61, %v852_v62 }
 0xaba   :  { %v859_v5 = vmul.f32 2.0, %v857_v0  ;;  %v777_v6 = vsel %vm776_vm13, %v1844_v44, %v773_v63 }
 0xabb   :  { %v782_v7 = vsel %vm779_vm14, %v781_v3, %v777_v6 }
 0xabc   :  { %v1718_v8 = vadd.f32 -1.0, %v859_v5  ;;  %v784_v10 = vmul.f32 2.0, %v782_v7  ;;  %v791_v4 = vmul.f32 %v789_v52, %v782_v7 }
 0xabe   :  { %868 = vrot.lane.b32.xlu1 %v1718_v8, %s1901_s6  ;;  %v1715_v16 = vadd.f32 -1.0, %v784_v10 }
 0xac0   :  { %793 = vrot.lane.b32.xlu0 %v1715_v16, %s1901_s6 }
 0xac6   :  { %863 = vrot.lane.b32.xlu1 %v862_v20, %s1902_s15 }
 0xb30   :  { %v869_v22 = vpop.permute.xlu1 %868 }
 0xb31   :  { %v871_v51 = vmul.f32 %v869_v22, %v857_v0 }
 0xb32   :  { %v794_v23 = vpop.permute.xlu0 %793 }
 0xb33   :  { %v796_v24 = vmul.f32 %v794_v23, %v782_v7  ;;  %873 = vrot.lane.b32.xlu2 %v871_v51, %s1902_s15 }
 0xb35   :  { %798 = vrot.lane.b32.xlu0 %v796_v24, %s1902_s15 }
 0xb38   :  { %v864_v15 = vpop.permute.xlu1 %863 }
 0xb39   :  { %v866_v25 = vmul.f32 %v864_v15, %v857_v0 }
 0xb8d   :  { %v874_v26 = vpop.permute.xlu2 %873 }
 0xb8e   :  { %v876_v11 = vadd.f32 %v874_v26, %v866_v25 }
 0xb90   :  { %1845 = vtanh.f32 %v876_v11 }
 0xb96   :  { %v1846_v2 = vpop.eup %1845 }
 0xb97   :  { %879 = vrot.lane.b32.xlu1 %v1846_v2, %s1901_s6 }
 0xb9f   :  { %892 = vrot.lane.b32.xlu1 %v876_v11, %s1903_s16 }
 0xba7   :  { %v799_v27 = vpop.permute.xlu0 %798 }
 0xba8   :  { %v801_v28 = vadd.f32 %v799_v27, %v791_v4 }
 0xbaa   :  { %1847 = vtanh.f32 %v801_v28  ;;  %v818_v32 = vrot.slane %v801_v28, 2 }
 0xbb0   :  { %v1848_v29 = vpop.eup %1847 }
 0xbb1   :  { %804 = vrot.lane.b32.xlu0 %v1848_v29, %s1901_s6 }
 0xc09   :  { %v880_v30 = vpop.permute.xlu1 %879 }
 0xc0a   :  { %v882_v31 = vmul.f32 %v880_v30, %v857_v0 }
 0xc0c   :  { %884 = vrot.lane.b32.xlu0 %v882_v31, %s1902_s15 }
 0xc11   :  { %v893_v25 = vpop.permute.xlu1 %892 }
 0xc12   :  { %v2301_v27 = vsel %vm59_vm15, %v893_v25, %v862_v20  ;;  %v822_v20 = vrot.slane %v2204_v18, 6 }
 0xc13   :  { %v1032_v30 = vrot.slane %v2301_v27, 6 }
 0xc14   :  { %819 = vrot.lane.b32.xlu0 %v818_v32, %s1903_s16 }
 0xc23   :  { %v805_v33 = vpop.permute.xlu0 %804 }
 0xc24   :  { %v807_v34 = vmul.f32 %v805_v33, %v782_v7 }
 0xc26   :  { %v809_v35 = vrot.slane %v807_v34, 2 }
 0xc28   :  { %810 = vrot.lane.b32.xlu2 %v809_v35, %s1902_s15 }
 0xc7e   :  { %v885_v38 = vpop.permute.xlu0 %884 }
 0xc7f   :  { %v2268_v17 = vsel %vm59_vm15, %v885_v38, %v888_v37 }
 0xc80   :  { %v897_v60 = vpack.c.bf16 %v2268_v17, %v2268_v17 }
 0xc82   :  { %v811_v41 = vpop.permute.xlu2 %810  ;;  %1720 = vmatmul.msk.bf16.vlgmr.msrb.gmra.mxu3 %vm100_vm2, %v897_v60  ;;  %1723 = vmatmul.msk.bf16.vlgmr.msra.gmra.mxu0 %vm100_vm2, %v897_v60 }
 0xc83   :  { %v2277_v42 = vsel %vm58_vm10, %v811_v41, %v814_v40  ;;  %1427 = vmatpush.bf16.msrb.mxu3 %v2017_v45  ;;  %1445 = vmatpush.bf16.msra.mxu0 %v2022_v46  ;;  %v1896_v45 = vld [vmem:[%s2489_s3] sm:$0xff] }
 0xc84   :  { %v898_v43 = vpack.c.bf16 %v2277_v42, %v2277_v42 }
 0xc86   :  { %v900_v44 = vrot.slane %v898_v43, 3  ;;  %v820_v56 = vpop.permute.xlu0 %819 }
 0xc87   :  { %1428 = vmatpush.bf16.msrb.mxu3 %v2046_v53  ;;  %1446 = vmatpush.bf16.msra.mxu0 %v2051_v54  ;;  %v824_v35 = vsel %vm58_vm10, %v820_v56, %v822_v20 }
 0xc88   :  { %1719 = vmatmul.msk.bf16.vlgmr.msrb.gmra.mxu2 %vm100_vm2, %v900_v44  ;;  %v957_v37 = vrot.slane %v824_v35, 6 }
 0xc89   :  { %1345 = vmatpush.bf16.msrb.mxu2 %v1895_v19 }
 0xc8d   :  { %1346 = vmatpush.bf16.msrb.mxu2 %v1896_v45 }
 0xcff   :  { %v1001_v46 = vpop.f32.mrf.mxu0 }
 0xd00   :  { %v1006_v9 = vrot.slane %v1001_v46, 6 }
 0xd02   :  { %v1008_v47 = vadd.f32 %v1006_v9, %v2233_v39 }
 0xd04   :  { %v1009_v53 = vmul.f32 %v1008_v47, %v2006_v21 }
 0xd05   :  { %v929_v48 = vpop.f32.mrf.mxu3 }
 0xd06   :  { %v1724_v54 = vmul.f32 -1.442695, %v1009_v53 }
 0xd07   :  { %v1003_v50 = vpop.f32.mrf.mxu0 }
 0xd08   :  { %1849 = vpow2.f32 %v1724_v54 }
 0xd0b   :  { %v913_v13 = vpop.f32.mrf.mxu2 }
 0xd0c   :  { %v930_v55 = vadd.f32 %v929_v48, %v913_v13 }
 0xd0d   :  { %v931_v14 = vpop.f32.mrf.mxu3 }
 0xd0e   :  { %v1850_v57 = vpop.eup %1849  ;;  %v933_v58 = vadd.f32 %v2085_v1, %v930_v55 }
 0xd0f   :  { %v1013_v59 = vadd.f32 1.0, %v1850_v57  ;;  %v1058_v57 = vrot.slane %v2268_v17, 6 }
 0xd10   :  { %v934_v61 = vmul.f32 %v933_v58, %v2006_v21 }
 0xd11   :  { %1851 = vrcp.f32 %v1013_v59  ;;  %v1025_v8 = vand.u32 2147483648, %v1013_v59  ;;  %v1023_v12 = vand.u32 2147483647, %v1013_v59  ;;  %vm1019_vm1 = vweird.f32 %v1013_v59 }
 0xd12   :  { %v1721_v62 = vmul.f32 -1.442695, %v934_v61 }
 0xd13   :  { %v915_v63 = vpop.f32.mrf.mxu2  ;;  %v1026_v1 = vor.u32 1.1754944e-38, %v1025_v8  ;;  %vm1024_vm4 = vcmp.eq.f32.partialorder %v1023_v12, 8.507059e+37 }
 0xd14   :  { %1853 = vpow2.f32 %v1721_v62  ;;  %v983_v63 = vrot.slane %v2277_v42, 6 }
 0xd17   :  { %v1852_v0 = vpop.eup %1851 }
 0xd18   :  { %v1015_v3 = vmul.f32 %v1852_v0, %v1013_v59  ;;  %vm1020_vm0 = vweird.f32 %v1852_v0 }
 0xd19   :  { %vm1021_vm3 = vmor %vm1019_vm1, %vm1020_vm0 }
 0xd1a   :  { %v1854_v5 = vpop.eup %1853  ;;  %v1016_v6 = vsub.f32 1.0, %v1015_v3 }
 0xd1b   :  { %v938_v7 = vadd.f32 1.0, %v1854_v5 }
 0xd1c   :  { %v1017_v10 = vmul.f32 %v1852_v0, %v1016_v6 }
 0xd1d   :  { %1855 = vrcp.f32 %v938_v7  ;;  %v950_v11 = vand.u32 2147483648, %v938_v7  ;;  %v948_v4 = vand.u32 2147483647, %v938_v7  ;;  %vm944_vm6 = vweird.f32 %v938_v7 }
 0xd1e   :  { %v1018_v16 = vadd.f32 %v1852_v0, %v1017_v10 }
 0xd1f   :  { %v951_v29 = vor.u32 1.1754944e-38, %v950_v11  ;;  %vm949_vm8 = vcmp.eq.f32.partialorder %v948_v4, 8.507059e+37 }
 0xd20   :  { %v1022_v22 = vsel %vm1021_vm3, %v1852_v0, %v1018_v16 }
 0xd21   :  { %v1027_v51 = vsel %vm1024_vm4, %v1026_v1, %v1022_v22 }
 0xd22   :  { %v1029_v23 = vmul.f32 2.0, %v1027_v51 }
 0xd23   :  { %v1856_v24 = vpop.eup %1855 }
 0xd24   :  { %v1725_v52 = vadd.f32 -1.0, %v1029_v23  ;;  %v940_v15 = vmul.f32 %v1856_v24, %v938_v7  ;;  %vm945_vm5 = vweird.f32 %v1856_v24 }
 0xd25   :  { %vm946_vm7 = vmor %vm944_vm6, %vm945_vm5 }
 0xd26   :  { %1038 = vrot.lane.b32.xlu2 %v1725_v52, %s1901_s6  ;;  %v941_v26 = vsub.f32 1.0, %v940_v15 }
 0xd28   :  { %v942_v2 = vmul.f32 %v1856_v24, %v941_v26 }
 0xd2a   :  { %v943_v28 = vadd.f32 %v1856_v24, %v942_v2  ;;  %v2348_v2 = vld [vmem:[%s2495_s7] ss:$0 sm:$0xff] }
 0xd2c   :  { %v947_v31 = vsel %vm946_vm7, %v1856_v24, %v943_v28 }
 0xd2d   :  { %v952_v32 = vsel %vm949_vm8, %v951_v29, %v947_v31 }
 0xd2e   :  { %1033 = vrot.lane.b32.xlu2 %v1032_v30, %s1902_s15  ;;  %v954_v33 = vmul.f32 2.0, %v952_v32 }
 0xd30   :  { %v1722_v34 = vadd.f32 -1.0, %v954_v33 }
 0xd32   :  { %963 = vrot.lane.b32.xlu1 %v1722_v34, %s1901_s6 }
 0xd3a   :  { %958 = vrot.lane.b32.xlu1 %v957_v37, %s1902_s15 }
 0xd80   :  { %v1039_v38 = vpop.permute.xlu2 %1038 }
 0xd81   :  { %v1041_v60 = vmul.f32 %v1039_v38, %v1027_v51 }
 0xd83   :  { %1043 = vrot.lane.b32.xlu0 %v1041_v60, %s1902_s15 }
 0xd88   :  { %v1034_v43 = vpop.permute.xlu2 %1033 }
 0xd89   :  { %v1036_v44 = vmul.f32 %v1034_v43, %v1027_v51 }
 0xda4   :  { %v964_v40 = vpop.permute.xlu1 %963 }
 0xda5   :  { %v966_v41 = vmul.f32 %v964_v40, %v952_v32 }
 0xda7   :  { %968 = vrot.lane.b32.xlu2 %v966_v41, %s1902_s15 }
 0xdac   :  { %v959_v18 = vpop.permute.xlu1 %958 }
 0xdad   :  { %v961_v49 = vmul.f32 %v959_v18, %v952_v32 }
 0xdf5   :  { %v1044_v19 = vpop.permute.xlu0 %1043 }
 0xdf6   :  { %v1046_v45 = vadd.f32 %v1044_v19, %v1036_v44 }
 0xdf8   :  { %1857 = vtanh.f32 %v1046_v45 }
 0xdfe   :  { %v1858_v46 = vpop.eup %1857 }
 0xdff   :  { %1049 = vrot.lane.b32.xlu0 %v1858_v46, %s1901_s6 }
 0xe01   :  { %v969_v9 = vpop.permute.xlu2 %968 }
 0xe02   :  { %v971_v47 = vadd.f32 %v969_v9, %v961_v49 }
 0xe04   :  { %1859 = vtanh.f32 %v971_v47 }
 0xe0a   :  { %v1860_v53 = vpop.eup %1859 }
 0xe0b   :  { %974 = vrot.lane.b32.xlu1 %v1860_v53, %s1901_s6 }
 0xe13   :  { %987 = vrot.lane.b32.xlu1 %v971_v47, %s1903_s16 }
 0xe71   :  { %v1050_v48 = vpop.permute.xlu0 %1049 }
 0xe72   :  { %v1052_v54 = vmul.f32 %v1050_v48, %v1027_v51 }
 0xe74   :  { %1054 = vrot.lane.b32.xlu2 %v1052_v54, %s1902_s15 }
 0xe7c   :  { %1062 = vrot.lane.b32.xlu2 %v1046_v45, %s1903_s16 }
 0xe7d   :  { %v975_v50 = vpop.permute.xlu1 %974 }
 0xe7e   :  { %v977_v13 = vmul.f32 %v975_v50, %v952_v32 }
 0xe80   :  { %979 = vrot.lane.b32.xlu0 %v977_v13, %s1902_s15 }
 0xe85   :  { %v988_v55 = vpop.permute.xlu1 %987 }
 0xe86   :  { %v2322_v14 = vsel %vm59_vm15, %v988_v55, %v957_v37 }
 0xe87   :  { %1127 = vrot.lane.b32.xlu2 %v2322_v14, %s1902_s15 }
 0xece   :  { %v1055_v58 = vpop.permute.xlu2 %1054 }
 0xecf   :  { %v2329_v59 = vsel %vm59_vm15, %v1055_v58, %v1058_v57 }
 0xed0   :  { %v1067_v61 = vpack.c.bf16 %v2329_v59, %v2329_v59 }
 0xed2   :  { %v1086_v62 = vrot.slane %v1067_v61, 1 }
 0xed4   :  { %1727 = vmatmul.msk.bf16.vlgmr.msra.gmra.mxu2 %vm100_vm2, %v1086_v62  ;;  %1730 = vmatmul.msk.bf16.vlgmr.msra.gmra.mxu3 %vm100_vm2, %v1086_v62 }
 0xed6   :  { %v1063_v37 = vpop.permute.xlu2 %1062 }
 0xed7   :  { %v2357_v38 = vsel %vm59_vm15, %v1063_v37, %v1032_v30 }
 0xed8   :  { %v1204_v41 = vrot.slane %v2357_v38, 6 }
 0xee1   :  { %v1128_v55 = vpop.permute.xlu2 %1127 }
 0xef2   :  { %v980_v0 = vpop.permute.xlu0 %979 }
 0xef3   :  { %v2338_v3 = vsel %vm59_vm15, %v980_v0, %v983_v63 }
 0xef4   :  { %v1068_v17 = vpack.c.bf16 %v2338_v3, %v2338_v3 }
 0xef6   :  { %1726 = vmatmul.msk.bf16.vlgmr.msra.gmra.mxu1 %vm100_vm2, %v1068_v17 }
 0xf57   :  { %v1099_v5 = vpop.f32.mrf.mxu2  ;;  %v1173_v6 = vpop.f32.mrf.mxu3 }
 0xf58   :  { %v1178_v7 = vrot.slane %v1173_v6, 4 }
 0xf5a   :  { %v1180_v8 = vadd.f32 %v1178_v7, %v2233_v39 }
 0xf5c   :  { %v1181_v10 = vmul.f32 %v1180_v8, %v2006_v21 }
 0xf5e   :  { %v1731_v12 = vmul.f32 -1.442695, %v1181_v10 }
 0xf5f   :  { %v1101_v16 = vpop.f32.mrf.mxu2  ;;  %v1175_v42 = vpop.f32.mrf.mxu3 }
 0xf60   :  { %1861 = vpow2.f32 %v1731_v12 }
 0xf66   :  { %v1862_v1 = vpop.eup %1861 }
 0xf67   :  { %v1185_v22 = vadd.f32 1.0, %v1862_v1  ;;  %v1230_v1 = vrot.slane %v2329_v59, 6 }
 0xf69   :  { %1863 = vrcp.f32 %v1185_v22  ;;  %v1197_v15 = vand.u32 2147483648, %v1185_v22  ;;  %v1195_v11 = vand.u32 2147483647, %v1185_v22  ;;  %vm1191_vm9 = vweird.f32 %v1185_v22 }
 0xf6b   :  { %v1198_v29 = vor.u32 1.1754944e-38, %v1197_v15  ;;  %vm1196_vm12 = vcmp.eq.f32.partialorder %v1195_v11, 8.507059e+37 }
 0xf6f   :  { %v1864_v51 = vpop.eup %1863 }
 0xf70   :  { %v1187_v23 = vmul.f32 %v1864_v51, %v1185_v22  ;;  %vm1192_vm10 = vweird.f32 %v1864_v51 }
 0xf71   :  { %vm1193_vm11 = vmor %vm1191_vm9, %vm1192_vm10 }
 0xf72   :  { %v1188_v24 = vsub.f32 1.0, %v1187_v23 }
 0xf73   :  { %v1081_v52 = vpop.f32.mrf.mxu1 }
 0xf74   :  { %v1100_v25 = vadd.f32 %v1099_v5, %v1081_v52  ;;  %v1189_v26 = vmul.f32 %v1864_v51, %v1188_v24  ;;  %v1153_v52 = vrot.slane %v2338_v3, 6 }
 0xf76   :  { %v1103_v4 = vadd.f32 %v2348_v2, %v1100_v25  ;;  %v1190_v28 = vadd.f32 %v1864_v51, %v1189_v26 }
 0xf78   :  { %v1104_v31 = vmul.f32 %v1103_v4, %v2006_v21  ;;  %v1194_v32 = vsel %vm1193_vm11, %v1864_v51, %v1190_v28 }
 0xf79   :  { %v1199_v33 = vsel %vm1196_vm12, %v1198_v29, %v1194_v32 }
 0xf7a   :  { %v1728_v34 = vmul.f32 -1.442695, %v1104_v31  ;;  %v1201_v56 = vmul.f32 2.0, %v1199_v33 }
 0xf7b   :  { %v1083_v20 = vpop.f32.mrf.mxu1 }
 0xf7c   :  { %1865 = vpow2.f32 %v1728_v34  ;;  %v1732_v35 = vadd.f32 -1.0, %v1201_v56 }
 0xf7e   :  { %1210 = vrot.lane.b32.xlu1 %v1732_v35, %s1901_s6 }
 0xf82   :  { %v1866_v60 = vpop.eup %1865 }
 0xf83   :  { %v1108_v40 = vadd.f32 1.0, %v1866_v60 }
 0xf85   :  { %1867 = vrcp.f32 %v1108_v40  ;;  %v1120_v45 = vand.u32 2147483648, %v1108_v40  ;;  %v1118_v27 = vand.u32 2147483647, %v1108_v40  ;;  %vm1114_vm14 = vweird.f32 %v1108_v40 }
 0xf86   :  { %1205 = vrot.lane.b32.xlu1 %v1204_v41, %s1902_s15 }
 0xf87   :  { %v1121_v30 = vor.u32 1.1754944e-38, %v1120_v45  ;;  %vm1119_vm1 = vcmp.eq.f32.partialorder %v1118_v27, 8.507059e+37 }
 0xf8b   :  { %v1868_v43 = vpop.eup %1867 }
 0xf8c   :  { %v1110_v44 = vmul.f32 %v1868_v43, %v1108_v40  ;;  %vm1115_vm13 = vweird.f32 %v1868_v43 }
 0xf8d   :  { %vm1116_vm0 = vmor %vm1114_vm14, %vm1115_vm13 }
 0xf8e   :  { %v1111_v19 = vsub.f32 1.0, %v1110_v44 }
 0xf90   :  { %v1112_v18 = vmul.f32 %v1868_v43, %v1111_v19 }
 0xf92   :  { %v1113_v46 = vadd.f32 %v1868_v43, %v1112_v18 }
 0xf94   :  { %v1117_v49 = vsel %vm1116_vm0, %v1868_v43, %v1113_v46  ;;  %vm1639_vm0 = vcmask 785408  }
 0xf95   :  { %v1122_v9 = vsel %vm1119_vm1, %v1121_v30, %v1117_v49  ;;  %vm1608_vm1 = vcmask 25600  }
 0xf96   :  { %v1124_v47 = vmul.f32 2.0, %v1122_v9  ;;  %v1130_v0 = vmul.f32 %v1128_v55, %v1122_v9 }
 0xf98   :  { %v1729_v53 = vadd.f32 -1.0, %v1124_v47 }
 0xf9a   :  { %1132 = vrot.lane.b32.xlu0 %v1729_v53, %s1901_s6 }
 0xff0   :  { %v1211_v48 = vpop.permute.xlu1 %1210 }
 0xff1   :  { %v1213_v54 = vmul.f32 %v1211_v48, %v1199_v33 }
 0xff3   :  { %1215 = vrot.lane.b32.xlu2 %v1213_v54, %s1902_s15 }
 0xff8   :  { %v1206_v57 = vpop.permute.xlu1 %1205 }
 0xff9   :  { %v1208_v58 = vmul.f32 %v1206_v57, %v1199_v33 }
0x100c   :  { %v1133_v50 = vpop.permute.xlu0 %1132 }
0x100d   :  { %v1135_v13 = vmul.f32 %v1133_v50, %v1122_v9 }
0x100f   :  { %1137 = vrot.lane.b32.xlu0 %v1135_v13, %s1902_s15 }
0x104d   :  { %v1216_v61 = vpop.permute.xlu2 %1215 }
0x104e   :  { %v1218_v62 = vadd.f32 %v1216_v61, %v1208_v58 }
0x1050   :  { %1869 = vtanh.f32 %v1218_v62 }
0x1056   :  { %v1870_v63 = vpop.eup %1869 }
0x1057   :  { %1221 = vrot.lane.b32.xlu1 %v1870_v63, %s1901_s6 }
0x1081   :  { %v1138_v17 = vpop.permute.xlu0 %1137 }
0x1082   :  { %v1140_v5 = vadd.f32 %v1138_v17, %v1130_v0 }
0x1084   :  { %1871 = vtanh.f32 %v1140_v5  ;;  %v1157_v6 = vrot.slane %v1140_v5, 6 }
0x1086   :  { %1158 = vrot.lane.b32.xlu1 %v1157_v6, %s1903_s16 }
0x108a   :  { %v1872_v7 = vpop.eup %1871 }
0x108b   :  { %1143 = vrot.lane.b32.xlu0 %v1872_v7, %s1901_s6 }
0x10c9   :  { %v1222_v8 = vpop.permute.xlu1 %1221 }
0x10ca   :  { %v1224_v10 = vmul.f32 %v1222_v8, %v1199_v33 }
0x10cc   :  { %1226 = vrot.lane.b32.xlu0 %v1224_v10, %s1902_s15  ;;  %v1161_v10 = vrot.slane %v2322_v14, 6 }
0x10d4   :  { %1234 = vrot.lane.b32.xlu0 %v1218_v62, %s1903_s16 }
0x10f8   :  { %v1159_v8 = vpop.permute.xlu1 %1158 }
0x10fd   :  { %v1144_v12 = vpop.permute.xlu0 %1143 }
0x10fe   :  { %v1146_v16 = vmul.f32 %v1144_v12, %v1122_v9  ;;  %v1163_v12 = vsel %vm59_vm15, %v1159_v8, %v1161_v10 }
0x1100   :  { %v1148_v42 = vrot.slane %v1146_v16, 6  ;;  %v1301_v16 = vrot.slane %v1163_v12, 2 }
0x1102   :  { %1149 = vrot.lane.b32.xlu2 %v1148_v42, %s1902_s15 }
0x113e   :  { %v1227_v22 = vpop.permute.xlu0 %1226 }
0x113f   :  { %v2375_v51 = vsel %vm59_vm15, %v1227_v22, %v1230_v1 }
0x1140   :  { %v1239_v23 = vpack.c.bf16 %v2375_v51, %v2375_v51 }
0x1142   :  { %v1260_v24 = vrot.slane %v1239_v23, 2 }
0x1144   :  { %1734 = vmatmul.msk.bf16.vlgmr.msrb.gmra.mxu1 %vm100_vm2, %v1260_v24  ;;  %1737 = vmatmul.msk.bf16.vlgmr.msrb.gmra.mxu2 %vm100_vm2, %v1260_v24 }
0x1146   :  { %v1235_v54 = vpop.permute.xlu0 %1234 }
0x1147   :  { %v2398_v13 = vsel %vm59_vm15, %v1235_v54, %v1204_v41 }
0x1148   :  { %v1379_v55 = vrot.slane %v2398_v13, 6  ;;  %v1782_v13 = vld [vmem:[%s2499_s10 + $0x10] sm:$0xff] }
0x115c   :  { %v1150_v15 = vpop.permute.xlu2 %1149 }
0x115d   :  { %v2384_v25 = vsel %vm59_vm15, %v1150_v15, %v1153_v52 }
0x115e   :  { %v1240_v59 = vpack.c.bf16 %v2384_v25, %v2384_v25 }
0x1160   :  { %v1242_v26 = vrot.slane %v1240_v59, 1 }
0x1162   :  { %1733 = vmatmul.msk.bf16.vlgmr.msrb.gmra.mxu0 %vm100_vm2, %v1242_v26 }
0x11c1   :  { %v1273_v11 = vpop.f32.mrf.mxu1 }
0x11c7   :  { %v1348_v4 = vpop.f32.mrf.mxu2 }
0x11c8   :  { %v1353_v28 = vrot.slane %v1348_v4, 2 }
0x11c9   :  { %v1275_v29 = vpop.f32.mrf.mxu1 }
0x11ca   :  { %v1355_v31 = vadd.f32 %v1353_v28, %v2233_v39 }
0x11cc   :  { %v1356_v32 = vmul.f32 %v1355_v31, %v2006_v21 }
0x11ce   :  { %v1738_v3 = vmul.f32 -1.442695, %v1356_v32 }
0x11cf   :  { %v1350_v33 = vpop.f32.mrf.mxu2 }
0x11d0   :  { %1873 = vpow2.f32 %v1738_v3  ;;  %v1336_v33 = vrot.slane %v1163_v12, 6 }
0x11d6   :  { %v1874_v34 = vpop.eup %1873 }
0x11d7   :  { %v1360_v56 = vadd.f32 1.0, %v1874_v34 }
0x11d9   :  { %1875 = vrcp.f32 %v1360_v56  ;;  %v1372_v44 = vand.u32 2147483648, %v1360_v56  ;;  %v1370_v39 = vand.u32 2147483647, %v1360_v56  ;;  %vm1366_vm4 = vweird.f32 %v1360_v56 }
0x11db   :  { %v1373_v30 = vor.u32 1.1754944e-38, %v1372_v44  ;;  %vm1371_vm6 = vcmp.eq.f32.partialorder %v1370_v39, 8.507059e+37  ;;  %v1328_v44 = vrot.slane %v2384_v25, 6 }
0x11df   :  { %v1876_v20 = vpop.eup %1875  ;;  %v1255_v35 = vpop.f32.mrf.mxu0 }
0x11e0   :  { %v1274_v37 = vadd.f32 %v1273_v11, %v1255_v35  ;;  %v1362_v60 = vmul.f32 %v1876_v20, %v1360_v56  ;;  %vm1367_vm3 = vweird.f32 %v1876_v20 }
0x11e1   :  { %vm1368_vm5 = vmor %vm1366_vm4, %vm1367_vm3 }
0x11e2   :  { %v1277_v40 = vadd.f32 %v2348_v2, %v1274_v37  ;;  %v1363_v43 = vsub.f32 1.0, %v1362_v60 }
0x11e4   :  { %v1278_v19 = vmul.f32 %v1277_v40, %v2006_v21  ;;  %v1364_v45 = vmul.f32 %v1876_v20, %v1363_v43  ;;  %v1405_v40 = vrot.slane %v2375_v51, 6 }
0x11e6   :  { %v1735_v18 = vmul.f32 -1.442695, %v1278_v19  ;;  %v1365_v27 = vadd.f32 %v1876_v20, %v1364_v45 }
0x11e7   :  { %v1257_v46 = vpop.f32.mrf.mxu0 }
0x11e8   :  { %1877 = vpow2.f32 %v1735_v18  ;;  %v1369_v49 = vsel %vm1368_vm5, %v1876_v20, %v1365_v27 }
0x11e9   :  { %v1374_v9 = vsel %vm1371_vm6, %v1373_v30, %v1369_v49 }
0x11ea   :  { %v1376_v47 = vmul.f32 2.0, %v1374_v9 }
0x11ec   :  { %v1739_v53 = vadd.f32 -1.0, %v1376_v47 }
0x11ee   :  { %v1878_v48 = vpop.eup %1877  ;;  %1385 = vrot.lane.b32.xlu1 %v1739_v53, %s1901_s6 }
0x11ef   :  { %v1282_v50 = vadd.f32 1.0, %v1878_v48 }
0x11f1   :  { %1879 = vrcp.f32 %v1282_v50  ;;  %v1294_v62 = vand.u32 2147483648, %v1282_v50  ;;  %v1292_v0 = vand.u32 2147483647, %v1282_v50  ;;  %vm1288_vm8 = vweird.f32 %v1282_v50 }
0x11f3   :  { %v1295_v38 = vor.u32 1.1754944e-38, %v1294_v62  ;;  %vm1293_vm9 = vcmp.eq.f32.partialorder %v1292_v0, 8.507059e+37 }
0x11f6   :  { %1380 = vrot.lane.b32.xlu1 %v1379_v55, %s1902_s15 }
0x11f7   :  { %v1880_v57 = vpop.eup %1879 }
0x11f8   :  { %v1284_v58 = vmul.f32 %v1880_v57, %v1282_v50  ;;  %vm1289_vm7 = vweird.f32 %v1880_v57 }
0x11f9   :  { %vm1290_vm10 = vmor %vm1288_vm8, %vm1289_vm7 }
0x11fa   :  { %v1285_v61 = vsub.f32 1.0, %v1284_v58 }
0x11fc   :  { %v1286_v63 = vmul.f32 %v1880_v57, %v1285_v61 }
0x11fe   :  { %v1287_v17 = vadd.f32 %v1880_v57, %v1286_v63 }
0x1200   :  { %v1291_v41 = vsel %vm1290_vm10, %v1880_v57, %v1287_v17 }
0x1201   :  { %v1296_v5 = vsel %vm1293_vm9, %v1295_v38, %v1291_v41 }
0x1202   :  { %v1298_v6 = vmul.f32 2.0, %v1296_v5 }
0x1204   :  { %v1736_v7 = vadd.f32 -1.0, %v1298_v6 }
0x1206   :  { %1307 = vrot.lane.b32.xlu2 %v1736_v7, %s1901_s6 }
0x120e   :  { %1302 = vrot.lane.b32.xlu2 %v1301_v16, %s1902_s15 }
0x1260   :  { %v1386_v42 = vpop.permute.xlu1 %1385  ;;  %v1308_v1 = vpop.permute.xlu2 %1307 }
0x1261   :  { %v1388_v22 = vmul.f32 %v1386_v42, %v1374_v9  ;;  %v1310_v23 = vmul.f32 %v1308_v1, %v1296_v5 }
0x1263   :  { %1390 = vrot.lane.b32.xlu2 %v1388_v22, %s1902_s15  ;;  %1312 = vrot.lane.b32.xlu0 %v1310_v23, %s1902_s15  ;;  %v1779_v22 = vld [vmem:[%s2496_s8 + $0x8] sm:$0xff]  ;;  %v1778_v23 = vld [vmem:[%s2496_s8] sm:$0xff] }
0x1264   :  { %1546 = vmatpush.bf16.msra.mxu1 %v1779_v22 }
0x1268   :  { %v1303_v24 = vpop.permute.xlu2 %1302  ;;  %v1381_v52 = vpop.permute.xlu1 %1380  ;;  %1547 = vmatpush.bf16.msra.mxu1 %v1778_v23 }
0x1269   :  { %v1383_v15 = vmul.f32 %v1381_v52, %v1374_v9  ;;  %v1305_v11 = vmul.f32 %v1303_v24, %v1296_v5 }
0x12bd   :  { %v1391_v59 = vpop.permute.xlu2 %1390 }
0x12be   :  { %v2411_v26 = vadd.f32 %v1391_v59, %v1383_v15 }
0x12c0   :  { %1881 = vtanh.f32 %v2411_v26 }
0x12c6   :  { %v1882_v14 = vpop.eup %1881 }
0x12c7   :  { %1396 = vrot.lane.b32.xlu1 %v1882_v14, %s1901_s6 }
0x12d5   :  { %v1313_v4 = vpop.permute.xlu0 %1312 }
0x12d6   :  { %v1315_v28 = vadd.f32 %v1313_v4, %v1305_v11 }
0x12d8   :  { %1883 = vtanh.f32 %v1315_v28  ;;  %v1332_v29 = vrot.slane %v1315_v28, 4 }
0x12da   :  { %1333 = vrot.lane.b32.xlu1 %v1332_v29, %s1903_s16 }
0x12de   :  { %v1884_v31 = vpop.eup %1883 }
0x12df   :  { %1318 = vrot.lane.b32.xlu0 %v1884_v31, %s1901_s6 }
0x1339   :  { %v1397_v32 = vpop.permute.xlu1 %1396 }
0x133a   :  { %v1399_v3 = vmul.f32 %v1397_v32, %v1374_v9 }
0x133c   :  { %1401 = vrot.lane.b32.xlu0 %v1399_v3, %s1902_s15 }
0x134c   :  { %v1334_v34 = vpop.permute.xlu1 %1333 }
0x134d   :  { %v2420_v56 = vsel %vm59_vm15, %v1334_v34, %v1336_v33  ;;  %v1783_v34 = vld [vmem:[%s2499_s10 + $0x18] sm:$0xff] }
0x134e   :  { %v1476_v20 = vrot.slane %v2420_v56, 4  ;;  %v1511_v3 = vrot.slane %v2420_v56, 6  ;;  %1599 = vmatpush.bf16.msra.mxu2 %v1783_v34 }
0x1350   :  { %1477 = vrot.lane.b32.xlu0 %v1476_v20, %s1902_s15 }
0x1351   :  { %v1319_v35 = vpop.permute.xlu0 %1318 }
0x1352   :  { %v1321_v37 = vmul.f32 %v1319_v35, %v1296_v5  ;;  %1600 = vmatpush.bf16.msra.mxu2 %v1782_v13  ;;  %v1793_v35 = vld [vmem:[%s2497_s9] ss:$0 sm:$0xff] }
0x1354   :  { %v1323_v60 = vrot.slane %v1321_v37, 4 }
0x1356   :  { %1324 = vrot.lane.b32.xlu2 %v1323_v60, %s1902_s15 }
0x13ae   :  { %v1402_v43 = vpop.permute.xlu0 %1401 }
0x13af   :  { %v2429_v19 = vsel %vm59_vm15, %v1402_v43, %v1405_v40 }
0x13b0   :  { %v1414_v45 = vpack.c.bf16 %v2429_v19, %v2429_v19  ;;  %v1325_v39 = vpop.permute.xlu2 %1324 }
0x13b1   :  { %v1330_v18 = vsel %vm59_vm15, %v1325_v39, %v1328_v44 }
0x13b2   :  { %v1435_v27 = vrot.slane %v1414_v45, 3  ;;  %v1415_v46 = vpack.c.bf16 %v1330_v18, %v1330_v18  ;;  %v1503_v14 = vrot.slane %v1330_v18, 6 }
0x13b4   :  { %v1417_v30 = vrot.slane %v1415_v46, 2  ;;  %1741 = vmatmul.msk.bf16.vlgmr.msra.gmra.mxu0 %vm100_vm2, %v1435_v27  ;;  %v1794_v46 = vld [vmem:[%s2498_s11] ss:$0 sm:$0xff] }
0x13b6   :  { %1740 = vmatmul.msk.bf16.vlgmr.msrb.gmra.mxu3 %vm100_vm2, %v1417_v30 }
0x13c2   :  { %v1478_v10 = vpop.permute.xlu0 %1477 }
0x1431   :  { %v1448_v51 = vpop.f32.mrf.mxu0 }
0x1439   :  { %v1430_v25 = vpop.f32.mrf.mxu3  ;;  %v1450_v49 = vpop.f32.mrf.mxu0 }
0x143a   :  { %v1449_v9 = vadd.f32 %v1448_v51, %v1430_v25 }
0x143c   :  { %v1452_v47 = vadd.f32 %v2348_v2, %v1449_v9 }
0x143e   :  { %v1453_v53 = vmul.f32 %v1452_v47, %v2006_v21 }
0x1440   :  { %v1742_v48 = vmul.f32 -1.442695, %v1453_v53 }
0x1441   :  { %v1432_v54 = vpop.f32.mrf.mxu3 }
0x1442   :  { %1885 = vpow2.f32 %v1742_v48 }
0x1448   :  { %v1886_v50 = vpop.eup %1885 }
0x1449   :  { %v1457_v57 = vadd.f32 1.0, %v1886_v50 }
0x144b   :  { %1887 = vrcp.f32 %v1457_v57  ;;  %v1469_v63 = vand.u32 2147483648, %v1457_v57  ;;  %v1467_v17 = vand.u32 2147483647, %v1457_v57  ;;  %vm1463_vm12 = vweird.f32 %v1457_v57 }
0x144d   :  { %v1470_v41 = vor.u32 1.1754944e-38, %v1469_v63  ;;  %vm1468_vm14 = vcmp.eq.f32.partialorder %v1467_v17, 8.507059e+37 }
0x1451   :  { %v1888_v58 = vpop.eup %1887 }
0x1452   :  { %v1459_v61 = vmul.f32 %v1888_v58, %v1457_v57  ;;  %vm1464_vm11 = vweird.f32 %v1888_v58 }
0x1453   :  { %vm1465_vm13 = vmor %vm1463_vm12, %vm1464_vm11 }
0x1454   :  { %v1460_v62 = vsub.f32 1.0, %v1459_v61 }
0x1456   :  { %v1461_v0 = vmul.f32 %v1888_v58, %v1460_v62 }
0x1458   :  { %v1462_v38 = vadd.f32 %v1888_v58, %v1461_v0 }
0x145a   :  { %v1466_v2 = vsel %vm1465_vm13, %v1888_v58, %v1462_v38 }
0x145b   :  { %v1471_v21 = vsel %vm1468_vm14, %v1470_v41, %v1466_v2 }
0x145c   :  { %v1473_v5 = vmul.f32 2.0, %v1471_v21  ;;  %v1480_v12 = vmul.f32 %v1478_v10, %v1471_v21 }
0x145e   :  { %v1743_v6 = vadd.f32 -1.0, %v1473_v5 }
0x1460   :  { %1482 = vrot.lane.b32.xlu2 %v1743_v6, %s1901_s6 }
0x14ba   :  { %v1483_v7 = vpop.permute.xlu2 %1482 }
0x14bb   :  { %v1485_v8 = vmul.f32 %v1483_v7, %v1471_v21 }
0x14bd   :  { %1487 = vrot.lane.b32.xlu1 %v1485_v8, %s1902_s15 }
0x152f   :  { %v1488_v16 = vpop.permute.xlu1 %1487 }
0x1530   :  { %v1490_v42 = vadd.f32 %v1488_v16, %v1480_v12 }
0x1532   :  { %1889 = vtanh.f32 %v1490_v42  ;;  %v1507_v59 = vrot.slane %v1490_v42, 2 }
0x1538   :  { %v1890_v1 = vpop.eup %1889 }
0x1539   :  { %1493 = vrot.lane.b32.xlu2 %v1890_v1, %s1901_s6 }
0x1541   :  { %1409 = vrot.lane.b32.xlu2 %v2411_v26, %s1903_s16 }
0x1593   :  { %v1494_v24 = vpop.permute.xlu2 %1493 }
0x1594   :  { %v1496_v52 = vmul.f32 %v1494_v24, %v1471_v21 }
0x1596   :  { %v1498_v15 = vrot.slane %v1496_v52, 2 }
0x1598   :  { %1499 = vrot.lane.b32.xlu0 %v1498_v15, %s1902_s15 }
0x159b   :  { %v1410_v29 = vpop.permute.xlu2 %1409 }
0x159c   :  { %v1413_v31 = vsel %vm59_vm15, %v1410_v29, %v1379_v55  ;;  %v1781_v55 = vld [vmem:[%s2499_s10 + $0x8] sm:$0xff] }
0x159d   :  { %1601 = vmatpush.bf16.msra.mxu2 %v1781_v55 }
0x15a0   :  { %1508 = vrot.lane.b32.xlu0 %v1507_v59, %s1903_s16 }
0x15a1   :  { %1602 = vmatpush.bf16.msra.mxu2 %v1780_v36 }
0x160a   :  { %v1500_v26 = vpop.permute.xlu0 %1499 }
0x160b   :  { %v1505_v11 = vsel %vm59_vm15, %v1500_v26, %v1503_v14 }
0x160c   :  { %1623 = vrot.lane.b32.xlu0 %v1505_v11, %s1902_s15  ;;  %v1514_v4 = vpack.c.bf16 %v1505_v11, %v1505_v11 }
0x160e   :  { %v1524_v28 = vrot.slane %v1514_v4, 3 }
0x1610   :  { %1752 = vmatmul.msk.bf16.vlgmr.msra.gmra.mxu1 %vm100_vm2, %v1524_v28 }
0x1612   :  { %v1509_v32 = vpop.permute.xlu0 %1508 }
0x1613   :  { %v1513_v33 = vsel %vm59_vm15, %v1509_v32, %v1511_v3  ;;  %vm1591_vm15 = vcmask 523264  }
0x1614   :  { %1627 = vrot.lane.b32.xlu0 %v1413_v31, %s1901_s6 }
0x161c   :  { %1631 = vrot.lane.b32.xlu0 %v1513_v33, %s1903_s16 }
0x167e   :  { %v1624_v56 = vpop.permute.xlu0 %1623 }
0x167f   :  { %v1637_v37 = vsel %vm100_vm2, %v2429_v19, %v1624_v56  ;;  %vm1641_vm2 = vcmask 31744  }
0x1686   :  { %v1628_v20 = vpop.permute.xlu0 %1627 }
0x1687   :  { %v1638_v40 = vsel %vm1591_vm15, %v1637_v37, %v1628_v20 }
0x168d   :  { %v1549_v60 = vpop.f32.mrf.mxu1 }
0x168e   :  { %v1550_v43 = vadd.f32 %v1793_v35, %v1549_v60  ;;  %v1632_v44 = vpop.permute.xlu0 %1631 }
0x168f   :  { %v1640_v45 = vsel %vm1639_vm0, %v1638_v40, %v1632_v44 }
0x1690   :  { %v1553_v39 = vmax.f32 %v1550_v43, 0.0  ;;  %1645 = vst.sshfl [vmem:[#allocation1] sm:$0xff pattern:$0x73625140] %v1640_v45 }
0x1692   :  { %v1554_v18 = vpack.c.bf16 %v1553_v39, %v1553_v39 }
0x1694   :  { %1769 = vmatmul.msk.bf16.vlgmr.msra.gmra.mxu2 %vm1591_vm15, %v1554_v18 }
0x1695   :  { %v1551_v27 = vpop.f32.mrf.mxu1 }
0x1717   :  { %v1604_v30 = vpop.f32.mrf.mxu2 }
0x1718   :  { %v1605_v51 = vadd.f32 %v1794_v46, %v1604_v30 }
0x171a   :  { %v1609_v25 = vsel %vm1608_vm1, %v1605_v51, -inf }
0x171b   :  { %1610 = vmax.xlane.f32.xlu1 %v1609_v25 }
0x171f   :  { %v1606_v19 = vpop.f32.mrf.mxu2 }
0x178e   :  { %v1611_v49 = vpop.xlane.xlu1 %1610 }
0x178f   :  { %v1612_v9 = vsub.f32 %v1605_v51, %v1611_v49 }
0x1791   :  { %v1613_v47 = vmul.f32 1.442695, %v1612_v9 }
0x1793   :  { %1891 = vpow2.f32 %v1613_v47 }
0x1799   :  { %v1892_v53 = vpop.eup %1891 }
0x179a   :  { %v1615_v48 = vsel %vm1608_vm1, %v1892_v53, 0.0 }
0x179b   :  { %1616 = vadd.xlane.f32.xlu2 %v1615_v48 }
0x180e   :  { %v1617_v54 = vpop.xlane.xlu2 %1616 }
0x180f   :  { %1893 = vlog2.f32 %v1617_v54 }
0x1815   :  { %v1894_v50 = vpop.eup %1893 }
0x1816   :  { %v1619_v57 = vmul.f32 0.6931472, %v1894_v50 }
0x1818   :  { %v1620_v58 = vadd.f32 %v1619_v57, %v1611_v49 }
0x181a   :  { %v1621_v61 = vsub.f32 %v1605_v51, %v1620_v58 }
0x181c   :  { %v1635_v62 = vrot.slane %v1621_v61, 2 }
0x181e   :  { %v1642_v63 = vsel %vm1641_vm2, %v1635_v62, 0.0 }
0x181f   :  { %1646 = vst.sshfl [vmem:[#allocation1 + $0x8] sm:$0xff pattern:$0x73625140] %v1642_v63 }
0x1826   :  { %v1648_v0 = vld [vmem:[#allocation1 + $0x3] ss:$4 sm:$0xff] }
0x1827   :  { %1650 = vst [vmem:[%s2500_s12] sm:$0xf] %v1648_v0 }

</bundles_post_ra>
